<compile_context>
chip_gen: v6e
topology: v6e:2x2x1
jax: 0.10.0
libtpu: 0.0.40
codegen_flags: <defaults>
</compile_context>

<pallas_src>
import functools
import math

import jax
import jax.numpy as jnp
from jax.experimental import pallas as pl
from jax.experimental.pallas import tpu as pltpu

LANE = 128
BN_EPS = 1e-5
F32 = jnp.float32
BF16 = jnp.bfloat16

# Sized so double-buffered e tiles + intermediates fit v7x's 64 MiB/TC VMEM too.
VMEM_LIMIT_BYTES = 32 * 1024 * 1024

VMEM_SPEC = pl.BlockSpec(memory_space=pltpu.MemorySpace.VMEM)


def _round_up(x, m):
    return (x + m - 1) // m * m


def pick_tile_dst(n, hp, budget_bytes=VMEM_LIMIT_BYTES):
    """Largest dst tile (multiple of 8, dividing n) whose double-buffered e/e_out
    streams (~4 live (tile, n, hp) f32 copies) stay well inside the VMEM budget."""
    per_row = 4 * n * hp * 4
    td = max(8, (budget_bytes // 2) // max(per_row, 1))
    td = min(td, n)
    while n % td:
        td -= 1
    return max(td, 1)


# ----------------------------------------------------------------------------
# Generic small linear:  o = x @ w + b   (bf16 operands, fp32 accumulate)
# Used for embedding_h and fc_out (node-count sized, whole-array in VMEM).
# ----------------------------------------------------------------------------
def _linear_kernel(x_ref, w_ref, b_ref, o_ref):
    o_ref[...] = (
        jnp.dot(x_ref[...].astype(BF16), w_ref[...],
                preferred_element_type=jnp.float32)
        + b_ref[...]
    )


def linear(x, w, b):
    m = x.shape[0]
    out = w.shape[1]
    return pl.pallas_call(
        _linear_kernel,
        out_shape=jax.ShapeDtypeStruct((m, out), F32),
        in_specs=[VMEM_SPEC, VMEM_SPEC, VMEM_SPEC],
        out_specs=VMEM_SPEC,
    )(x, w, b)


# ----------------------------------------------------------------------------
# Edge embedding: scalar edge feature -> HP channels via a VPU broadcast FMA
# (replaces the K=1 MXU matmul).  Tiled over dst rows, lane-dense output.
# ----------------------------------------------------------------------------
def _embed_e_kernel(eraw_ref, w_ref, b_ref, out_ref):
    out_ref[...] = (
        eraw_ref[...][:, :, None] * w_ref[...][None, :, :]
        + b_ref[...][None, :, :]
    )


def embed_edges(e_raw, w_e, b_e, tile_dst):
    n = e_raw.shape[0]
    hp = w_e.shape[1]
    return pl.pallas_call(
        _embed_e_kernel,
        out_shape=jax.ShapeDtypeStruct((n, n, hp), F32),
        grid=(n // tile_dst,),
        in_specs=[
            pl.BlockSpec((tile_dst, n), lambda i: (i, 0)),
            pl.BlockSpec((1, hp), lambda i: (0, 0)),
            pl.BlockSpec((1, hp), lambda i: (0, 0)),
        ],
        out_specs=pl.BlockSpec((tile_dst, n, hp), lambda i: (i, 0, 0)),
        compiler_params=pltpu.CompilerParams(
            dimension_semantics=("parallel",),
            vmem_limit_bytes=VMEM_LIMIT_BYTES,
        ),
    )(e_raw, w_e, b_e)


# ----------------------------------------------------------------------------
# Node projections A(h), B(h), D(h), E(h) in one call (4 MXU matmuls).
# ----------------------------------------------------------------------------
def _node_proj_kernel(h_ref, wa, ba, wb, bb, wd, bd, we, be,
                      ah_ref, bh_ref, dh_ref, eh_ref):
    hb = h_ref[...].astype(BF16)

    def proj(w_ref, b_ref):
        return jnp.dot(hb, w_ref[...], preferred_element_type=jnp.float32) + b_ref[...]

    ah_ref[...] = proj(wa, ba)
    bh_ref[...] = proj(wb, bb)
    dh_ref[...] = proj(wd, bd)
    eh_ref[...] = proj(we, be)


def node_projections(h, lp):
    n, hp = h.shape
    cost = pl.CostEstimate(
        flops=int(8 * n * hp * hp),
        transcendentals=0,
        bytes_accessed=int(4 * (5 * n * hp) + 2 * (4 * hp * hp)),
    )
    return pl.pallas_call(
        _node_proj_kernel,
        out_shape=tuple(jax.ShapeDtypeStruct((n, hp), F32) for _ in range(4)),
        in_specs=[VMEM_SPEC] * 9,
        out_specs=tuple([VMEM_SPEC] * 4),
        cost_estimate=cost,
    )(h, lp["WA"], lp["bA"], lp["WB"], lp["bB"],
      lp["WD"], lp["bD"], lp["WE"], lp["bE"])


# ----------------------------------------------------------------------------
# Per-layer edge/message kernel, tiled over destination-node blocks.
# ----------------------------------------------------------------------------
def _layer_edge_kernel(
    h_in_ref, e_ref, adj_ref, ah_ref, eh_ref, bh_ref, dh_ref,
    wc_ref, bc_ref, scale_h_ref, shift_h_ref, scale_e_ref, shift_e_ref,
    h_out_ref, e_out_ref,
):
    td, n, hp = e_ref.shape
    e_tile = e_ref[...]                                       # (TD, N, HP) f32

    # C(e) fused per tile: (TD*N, HP) @ (HP, HP), bf16 in / f32 accumulate.
    ce = (
        jnp.dot(e_tile.reshape(td * n, hp).astype(BF16), wc_ref[...],
                preferred_element_type=jnp.float32)
        + bc_ref[...]
    ).reshape(td, n, hp)

    # e_ij = C(e)[i,j] + D(h)[src=j] + E(h)[dst=i]
    e_new = ce + dh_ref[...][None, :, :] + eh_ref[...][:, None, :]

    # gates (fp32 sigmoid on the EUP), masked by the adjacency
    sigma = jax.nn.sigmoid(e_new) * adj_ref[...][:, :, None]

    num = jnp.sum(sigma * bh_ref[...][None, :, :], axis=1)     # (TD, HP)
    den = jnp.sum(sigma, axis=1)                               # (TD, HP)
    h_new = ah_ref[...] + num * pl.reciprocal(den + 1e-6, approx=True)

    # eval-mode BatchNorm folded into scale/shift, then ReLU, then residual.
    h_act = jnp.maximum(scale_h_ref[...] * h_new + shift_h_ref[...], 0.0)
    e_act = jnp.maximum(
        scale_e_ref[...][None, :, :] * e_new + shift_e_ref[...][None, :, :], 0.0)

    h_out_ref[...] = h_in_ref[...] + h_act
    e_out_ref[...] = e_tile + e_act


def gatedgcn_layer(h, e, adj, lp, *, tile_dst):
    n, hp = h.shape
    ah, bh, dh, eh = node_projections(h, lp)

    dst_vec = pl.BlockSpec((tile_dst, hp), lambda i: (i, 0))
    resident_vec = pl.BlockSpec((n, hp), lambda i: (0, 0))
    edge_blk = pl.BlockSpec((tile_dst, n, hp), lambda i: (i, 0, 0))
    adj_blk = pl.BlockSpec((tile_dst, n), lambda i: (i, 0))
    w_spec = pl.BlockSpec((hp, hp), lambda i: (0, 0))
    row_spec = pl.BlockSpec((1, hp), lambda i: (0, 0))

    cost = pl.CostEstimate(
        flops=int(2 * n * n * hp * hp + 12 * n * n * hp),
        transcendentals=int(n * n * hp),
        bytes_accessed=int(4 * (2 * n * n * hp + n * n + 6 * n * hp) + 2 * hp * hp),
    )

    h_out, e_out = pl.pallas_call(
        _layer_edge_kernel,
        out_shape=(
            jax.ShapeDtypeStruct((n, hp), F32),
            jax.ShapeDtypeStruct((n, n, hp), F32),
        ),
        grid=(n // tile_dst,),
        in_specs=[
            dst_vec,        # h_in (residual)   -> aliased with h_out
            edge_blk,       # e                 -> aliased with e_out
            adj_blk,        # adj
            dst_vec,        # Ah
            dst_vec,        # Eh
            resident_vec,   # Bh
            resident_vec,   # Dh
            w_spec,         # WC (bf16)
            row_spec,       # bC
            row_spec, row_spec, row_spec, row_spec,  # scale_h, shift_h, scale_e, shift_e
        ],
        out_specs=(dst_vec, edge_blk),
        input_output_aliases={0: 0, 1: 1},
        compiler_params=pltpu.CompilerParams(
            dimension_semantics=("parallel",),
            vmem_limit_bytes=VMEM_LIMIT_BYTES,
        ),
        cost_estimate=cost,
    )(h, e, adj, ah, eh, bh, dh,
      lp["WC"], lp["bC"], lp["scale_h"], lp["shift_h"], lp["scale_e"], lp["shift_e"])
    return h_out, e_out


# ----------------------------------------------------------------------------
# Parameter init (mirrors PyTorch nn.Linear / BatchNorm1d defaults, logical dims)
# ----------------------------------------------------------------------------
def init_linear(key, in_dim, out_dim):
    k = 1.0 / math.sqrt(float(in_dim))
    kw, kb = jax.random.split(key)
    w = jax.random.uniform(kw, (in_dim, out_dim), F32, -k, k)
    b = jax.random.uniform(kb, (1, out_dim), F32, -k, k)
    return w, b


def init_params(key, in_dim_node, hidden_dim, out_dim, n_layers):
    keys = jax.random.split(key, 3 + n_layers)
    params = {}
    params["emb_h_w"], params["emb_h_b"] = init_linear(keys[0], in_dim_node, hidden_dim)
    params["emb_e_w"], params["emb_e_b"] = init_linear(keys[1], 1, hidden_dim)

    layers = []
    for li in range(n_layers):
        lk = jax.random.split(keys[2 + li], 5)
        lp = {}
        for name, kk in zip(["A", "B", "C", "D", "E"], lk):
            w, b = init_linear(kk, hidden_dim, hidden_dim)
            lp[f"W{name}"] = w
            lp[f"b{name}"] = b
        lp["gamma_h"] = jnp.ones((1, hidden_dim), F32)
        lp["beta_h"] = jnp.zeros((1, hidden_dim), F32)
        lp["gamma_e"] = jnp.ones((1, hidden_dim), F32)
        lp["beta_e"] = jnp.zeros((1, hidden_dim), F32)
        layers.append(lp)
    params["layers"] = layers

    if out_dim != hidden_dim:
        params["fc_out_w"], params["fc_out_b"] = init_linear(
            keys[2 + n_layers], hidden_dim, out_dim)
    else:
        params["fc_out_w"] = None
        params["fc_out_b"] = None
    return params


# ----------------------------------------------------------------------------
# Host-side prep: zero-pad feature dims to 128 lanes, cast MXU weights to bf16,
# fold eval-mode BatchNorm inv_std into gamma.  Padded channels stay exactly 0.
# ----------------------------------------------------------------------------
def prepare_params(params, hidden_dim):
    hp = _round_up(hidden_dim, LANE)

    def pad2(w, rows, cols, dtype=F32):
        return jnp.pad(
            w, ((0, rows - w.shape[0]), (0, cols - w.shape[1]))).astype(dtype)

    out = {}
    in_dim = params["emb_h_w"].shape[0]
    out["emb_h_w"] = pad2(params["emb_h_w"], in_dim, hp, BF16)
    out["emb_h_b"] = pad2(params["emb_h_b"], 1, hp)
    out["emb_e_w"] = pad2(params["emb_e_w"], 1, hp)   # elementwise (VPU), keep f32
    out["emb_e_b"] = pad2(params["emb_e_b"], 1, hp)

    inv_std = 1.0 / math.sqrt(1.0 + BN_EPS)
    layers = []
    for lp in params["layers"]:
        q = {}
        for nm in "ABCDE":
            q[f"W{nm}"] = pad2(lp[f"W{nm}"], hp, hp, BF16)
            q[f"b{nm}"] = pad2(lp[f"b{nm}"], 1, hp)
        q["scale_h"] = pad2(lp["gamma_h"], 1, hp) * inv_std
        q["shift_h"] = pad2(lp["beta_h"], 1, hp)
        q["scale_e"] = pad2(lp["gamma_e"], 1, hp) * inv_std
        q["shift_e"] = pad2(lp["beta_e"], 1, hp)
        layers.append(q)
    out["layers"] = layers

    if params["fc_out_w"] is not None:
        od = params["fc_out_w"].shape[1]
        out["fc_out_w"] = pad2(params["fc_out_w"], hp, od, BF16)
        out["fc_out_b"] = params["fc_out_b"]
    else:
        out["fc_out_w"] = None
        out["fc_out_b"] = None
    return out


# ----------------------------------------------------------------------------
# Encoder forward
# ----------------------------------------------------------------------------
@functools.partial(jax.jit, static_argnames=("tile_dst", "out_dim"))
def encoder_forward(p, node_feat, edge_feat_2d, adj, *, tile_dst, out_dim):
    h = linear(node_feat, p["emb_h_w"], p["emb_h_b"])                    # (N, HP)
    e = embed_edges(edge_feat_2d, p["emb_e_w"], p["emb_e_b"], tile_dst)  # (N, N, HP)
    adj = adj.astype(F32)
    for lp in p["layers"]:
        h, e = gatedgcn_layer(h, e, adj, lp, tile_dst=tile_dst)
    if p["fc_out_w"] is not None:
        h = linear(h, p["fc_out_w"], p["fc_out_b"])
    return h[:, :out_dim]


if __name__ == "__main__":
    # net_params
    N = 16              # number of graph nodes
    enc_in_dim = 8
    enc_hidden_dim = 32  # logical hidden dim (padded to 128 lanes internally)
    enc_out_dim = 16     # != hidden_dim  => fc_out is exercised
    enc_layers = 2

    HP = _round_up(enc_hidden_dim, LANE)
    # cap at 8 so this tiny demo exercises a 2-block dst grid;
    # real graphs would just take pick_tile_dst(N, HP).
    tile_dst = min(8, pick_tile_dst(N, HP))

    key = jax.random.PRNGKey(0)
    k_feat, k_edge, k_adj, k_param = jax.random.split(key, 4)

    node_feat = jax.random.normal(k_feat, (N, enc_in_dim), F32)
    edge_feat = jax.random.normal(k_edge, (N, N), F32)   # dense scalar edge feature [dst, src]

    # adjacency: random edges + a ring so every node has in-degree >= 1
    rand_adj = (jax.random.uniform(k_adj, (N, N)) < 0.3).astype(F32)
    ring = jnp.zeros((N, N), F32).at[
        jnp.arange(N), (jnp.arange(N) - 1) % N
    ].set(1.0)
    adj = jnp.clip(rand_adj + ring, 0.0, 1.0)

    params = init_params(k_param, enc_in_dim, enc_hidden_dim, enc_out_dim, enc_layers)
    prepared = prepare_params(params, enc_hidden_dim)

    h_out = encoder_forward(prepared, node_feat, edge_feat, adj,
                            tile_dst=tile_dst, out_dim=enc_out_dim)
    h_out = jax.block_until_ready(h_out)
    assert h_out.shape == (N, enc_out_dim)
    assert bool(jnp.all(jnp.isfinite(h_out)))
    print("KERNEL_OK")
</pallas_src>

<mosaic_0001>
module attributes {stable_mosaic.version = 11 : i64} {
  func.func @_embed_e_kernel(%arg0: i32, %arg1: memref<8x16xf32, #tpu.memory_space<vmem>>, %arg2: memref<1x128xf32, #tpu.memory_space<vmem>>, %arg3: memref<1x128xf32, #tpu.memory_space<vmem>>, %arg4: memref<8x16x128xf32, #tpu.memory_space<vmem>>) attributes {dimension_semantics = [#tpu.dimension_semantics<parallel>], iteration_bounds = array<i64: 2>, scalar_prefetch = 0 : i64, scratch_operands = 0 : i64, tpu.core_type = #tpu.core_type<tc>, window_params = [{transform_indices = @transform_0, window_bounds = array<i64: 8, 16>}, {pipeline_mode = #tpu.pipeline_mode<synchronous>, transform_indices = @transform_1, window_bounds = array<i64: 1, 128>}, {pipeline_mode = #tpu.pipeline_mode<synchronous>, transform_indices = @transform_2, window_bounds = array<i64: 1, 128>}, {transform_indices = @transform_3, window_bounds = array<i64: 8, 16, 128>}]} {
    %c0 = arith.constant 0 : index
    %c0_0 = arith.constant 0 : index
    %0 = vector.load %arg1[%c0, %c0_0] : memref<8x16xf32, #tpu.memory_space<vmem>>, vector<8x16xf32>
    %1 = vector.shape_cast %0 : vector<8x16xf32> to vector<8x16x1xf32>
    %c0_1 = arith.constant 0 : index
    %c0_2 = arith.constant 0 : index
    %2 = vector.load %arg2[%c0_1, %c0_2] : memref<1x128xf32, #tpu.memory_space<vmem>>, vector<1x128xf32>
    %3 = vector.shape_cast %2 : vector<1x128xf32> to vector<1x1x128xf32>
    %4 = vector.broadcast %1 : vector<8x16x1xf32> to vector<8x16x128xf32>
    %5 = vector.broadcast %3 : vector<1x1x128xf32> to vector<8x16x128xf32>
    %6 = arith.mulf %4, %5 : vector<8x16x128xf32>
    %c0_3 = arith.constant 0 : index
    %c0_4 = arith.constant 0 : index
    %7 = vector.load %arg3[%c0_3, %c0_4] : memref<1x128xf32, #tpu.memory_space<vmem>>, vector<1x128xf32>
    %8 = vector.shape_cast %7 : vector<1x128xf32> to vector<1x1x128xf32>
    %9 = vector.broadcast %8 : vector<1x1x128xf32> to vector<8x16x128xf32>
    %10 = arith.addf %6, %9 : vector<8x16x128xf32>
    %c0_5 = arith.constant 0 : index
    %c0_6 = arith.constant 0 : index
    %c0_7 = arith.constant 0 : index
    %11 = vector.load %arg4[%c0_5, %c0_6, %c0_7] : memref<8x16x128xf32, #tpu.memory_space<vmem>>, vector<8x16x128xf32>
    tpu.vector_store %arg4[%c0_5, %c0_6, %c0_7], %10 {strides = array<i32>} : memref<8x16x128xf32, #tpu.memory_space<vmem>>, vector<8x16x128xf32>,
    return
  }
  func.func @transform_0(%arg0: i32) -> (i32, i32) {
    %c0_i32 = arith.constant 0 : i32
    %c0_i32_0 = arith.constant 0 : i32
    return %arg0, %c0_i32 : i32, i32
  }
  func.func @transform_1(%arg0: i32) -> (i32, i32) {
    %c0_i32 = arith.constant 0 : i32
    %c0_i32_0 = arith.constant 0 : i32
    %c0_i32_1 = arith.constant 0 : i32
    return %c0_i32, %c0_i32_0 : i32, i32
  }
  func.func @transform_2(%arg0: i32) -> (i32, i32) {
    %c0_i32 = arith.constant 0 : i32
    %c0_i32_0 = arith.constant 0 : i32
    %c0_i32_1 = arith.constant 0 : i32
    return %c0_i32, %c0_i32_0 : i32, i32
  }
  func.func @transform_3(%arg0: i32) -> (i32, i32, i32) {
    %c0_i32 = arith.constant 0 : i32
    %c0_i32_0 = arith.constant 0 : i32
    %c0_i32_1 = arith.constant 0 : i32
    return %arg0, %c0_i32, %c0_i32_0 : i32, i32, i32
  }
}

module attributes {stable_mosaic.version = 11 : i64} {
  func.func @_linear_kernel(%arg0: memref<16x8xf32, #tpu.memory_space<vmem>>, %arg1: memref<8x128xbf16, #tpu.memory_space<vmem>>, %arg2: memref<1x128xf32, #tpu.memory_space<vmem>>, %arg3: memref<16x128xf32, #tpu.memory_space<vmem>>) attributes {dimension_semantics = [], scalar_prefetch = 0 : i64, scratch_operands = 0 : i64, tpu.core_type = #tpu.core_type<tc>} {
    %c0 = arith.constant 0 : index
    %c0_0 = arith.constant 0 : index
    %0 = vector.load %arg0[%c0, %c0_0] : memref<16x8xf32, #tpu.memory_space<vmem>>, vector<16x8xf32>
    %1 = arith.truncf %0 : vector<16x8xf32> to vector<16x8xbf16>
    %c0_1 = arith.constant 0 : index
    %c0_2 = arith.constant 0 : index
    %2 = vector.load %arg1[%c0_1, %c0_2] : memref<8x128xbf16, #tpu.memory_space<vmem>>, vector<8x128xbf16>
    %cst = arith.constant dense<0.000000e+00> : vector<16x128xf32>
    %3 = tpu.matmul %1, %2, %cst {dimension_numbers = #tpu.dot_dimension_numbers<[1], [0], [0], [1], [0, 0, 1, 1], [], []>} : vector<16x8xbf16>, vector<8x128xbf16>, vector<16x128xf32> -> vector<16x128xf32>
    %c0_3 = arith.constant 0 : index
    %c0_4 = arith.constant 0 : index
    %4 = vector.load %arg2[%c0_3, %c0_4] : memref<1x128xf32, #tpu.memory_space<vmem>>, vector<1x128xf32>
    %5 = vector.broadcast %4 : vector<1x128xf32> to vector<16x128xf32>
    %6 = arith.addf %3, %5 : vector<16x128xf32>
    %c0_5 = arith.constant 0 : index
    %c0_6 = arith.constant 0 : index
    %7 = vector.load %arg3[%c0_5, %c0_6] : memref<16x128xf32, #tpu.memory_space<vmem>>, vector<16x128xf32>
    tpu.vector_store %arg3[%c0_5, %c0_6], %6 {strides = array<i32>} : memref<16x128xf32, #tpu.memory_space<vmem>>, vector<16x128xf32>,
    return
  }
}

module attributes {stable_mosaic.version = 11 : i64} {
  func.func @_node_proj_kernel(%arg0: memref<16x128xf32, #tpu.memory_space<vmem>>, %arg1: memref<128x128xbf16, #tpu.memory_space<vmem>>, %arg2: memref<1x128xf32, #tpu.memory_space<vmem>>, %arg3: memref<128x128xbf16, #tpu.memory_space<vmem>>, %arg4: memref<1x128xf32, #tpu.memory_space<vmem>>, %arg5: memref<128x128xbf16, #tpu.memory_space<vmem>>, %arg6: memref<1x128xf32, #tpu.memory_space<vmem>>, %arg7: memref<128x128xbf16, #tpu.memory_space<vmem>>, %arg8: memref<1x128xf32, #tpu.memory_space<vmem>>, %arg9: memref<16x128xf32, #tpu.memory_space<vmem>>, %arg10: memref<16x128xf32, #tpu.memory_space<vmem>>, %arg11: memref<16x128xf32, #tpu.memory_space<vmem>>, %arg12: memref<16x128xf32, #tpu.memory_space<vmem>>) attributes {dimension_semantics = [], scalar_prefetch = 0 : i64, scratch_operands = 0 : i64, tpu.core_type = #tpu.core_type<tc>} {
    %c0 = arith.constant 0 : index
    %c0_0 = arith.constant 0 : index
    %0 = vector.load %arg0[%c0, %c0_0] : memref<16x128xf32, #tpu.memory_space<vmem>>, vector<16x128xf32>
    %1 = arith.truncf %0 : vector<16x128xf32> to vector<16x128xbf16>
    %c0_1 = arith.constant 0 : index
    %c0_2 = arith.constant 0 : index
    %2 = vector.load %arg1[%c0_1, %c0_2] : memref<128x128xbf16, #tpu.memory_space<vmem>>, vector<128x128xbf16>
    %cst = arith.constant dense<0.000000e+00> : vector<16x128xf32>
    %3 = tpu.matmul %1, %2, %cst {dimension_numbers = #tpu.dot_dimension_numbers<[1], [0], [0], [1], [0, 0, 1, 1], [], []>} : vector<16x128xbf16>, vector<128x128xbf16>, vector<16x128xf32> -> vector<16x128xf32>
    %c0_3 = arith.constant 0 : index
    %c0_4 = arith.constant 0 : index
    %4 = vector.load %arg2[%c0_3, %c0_4] : memref<1x128xf32, #tpu.memory_space<vmem>>, vector<1x128xf32>
    %5 = vector.broadcast %4 : vector<1x128xf32> to vector<16x128xf32>
    %6 = arith.addf %3, %5 : vector<16x128xf32>
    %c0_5 = arith.constant 0 : index
    %c0_6 = arith.constant 0 : index
    %7 = vector.load %arg9[%c0_5, %c0_6] : memref<16x128xf32, #tpu.memory_space<vmem>>, vector<16x128xf32>
    tpu.vector_store %arg9[%c0_5, %c0_6], %6 {strides = array<i32>} : memref<16x128xf32, #tpu.memory_space<vmem>>, vector<16x128xf32>,
    %c0_7 = arith.constant 0 : index
    %c0_8 = arith.constant 0 : index
    %8 = vector.load %arg3[%c0_7, %c0_8] : memref<128x128xbf16, #tpu.memory_space<vmem>>, vector<128x128xbf16>
    %cst_9 = arith.constant dense<0.000000e+00> : vector<16x128xf32>
    %9 = tpu.matmul %1, %8, %cst_9 {dimension_numbers = #tpu.dot_dimension_numbers<[1], [0], [0], [1], [0, 0, 1, 1], [], []>} : vector<16x128xbf16>, vector<128x128xbf16>, vector<16x128xf32> -> vector<16x128xf32>
    %c0_10 = arith.constant 0 : index
    %c0_11 = arith.constant 0 : index
    %10 = vector.load %arg4[%c0_10, %c0_11] : memref<1x128xf32, #tpu.memory_space<vmem>>, vector<1x128xf32>
    %11 = vector.broadcast %10 : vector<1x128xf32> to vector<16x128xf32>
    %12 = arith.addf %9, %11 : vector<16x128xf32>
    %c0_12 = arith.constant 0 : index
    %c0_13 = arith.constant 0 : index
    %13 = vector.load %arg10[%c0_12, %c0_13] : memref<16x128xf32, #tpu.memory_space<vmem>>, vector<16x128xf32>
    tpu.vector_store %arg10[%c0_12, %c0_13], %12 {strides = array<i32>} : memref<16x128xf32, #tpu.memory_space<vmem>>, vector<16x128xf32>,
    %c0_14 = arith.constant 0 : index
    %c0_15 = arith.constant 0 : index
    %14 = vector.load %arg5[%c0_14, %c0_15] : memref<128x128xbf16, #tpu.memory_space<vmem>>, vector<128x128xbf16>
    %cst_16 = arith.constant dense<0.000000e+00> : vector<16x128xf32>
    %15 = tpu.matmul %1, %14, %cst_16 {dimension_numbers = #tpu.dot_dimension_numbers<[1], [0], [0], [1], [0, 0, 1, 1], [], []>} : vector<16x128xbf16>, vector<128x128xbf16>, vector<16x128xf32> -> vector<16x128xf32>
    %c0_17 = arith.constant 0 : index
    %c0_18 = arith.constant 0 : index
    %16 = vector.load %arg6[%c0_17, %c0_18] : memref<1x128xf32, #tpu.memory_space<vmem>>, vector<1x128xf32>
    %17 = vector.broadcast %16 : vector<1x128xf32> to vector<16x128xf32>
    %18 = arith.addf %15, %17 : vector<16x128xf32>
    %c0_19 = arith.constant 0 : index
    %c0_20 = arith.constant 0 : index
    %19 = vector.load %arg11[%c0_19, %c0_20] : memref<16x128xf32, #tpu.memory_space<vmem>>, vector<16x128xf32>
    tpu.vector_store %arg11[%c0_19, %c0_20], %18 {strides = array<i32>} : memref<16x128xf32, #tpu.memory_space<vmem>>, vector<16x128xf32>,
    %c0_21 = arith.constant 0 : index
    %c0_22 = arith.constant 0 : index
    %20 = vector.load %arg7[%c0_21, %c0_22] : memref<128x128xbf16, #tpu.memory_space<vmem>>, vector<128x128xbf16>
    %cst_23 = arith.constant dense<0.000000e+00> : vector<16x128xf32>
    %21 = tpu.matmul %1, %20, %cst_23 {dimension_numbers = #tpu.dot_dimension_numbers<[1], [0], [0], [1], [0, 0, 1, 1], [], []>} : vector<16x128xbf16>, vector<128x128xbf16>, vector<16x128xf32> -> vector<16x128xf32>
    %c0_24 = arith.constant 0 : index
    %c0_25 = arith.constant 0 : index
    %22 = vector.load %arg8[%c0_24, %c0_25] : memref<1x128xf32, #tpu.memory_space<vmem>>, vector<1x128xf32>
    %23 = vector.broadcast %22 : vector<1x128xf32> to vector<16x128xf32>
    %24 = arith.addf %21, %23 : vector<16x128xf32>
    %c0_26 = arith.constant 0 : index
    %c0_27 = arith.constant 0 : index
    %25 = vector.load %arg12[%c0_26, %c0_27] : memref<16x128xf32, #tpu.memory_space<vmem>>, vector<16x128xf32>
    tpu.vector_store %arg12[%c0_26, %c0_27], %24 {strides = array<i32>} : memref<16x128xf32, #tpu.memory_space<vmem>>, vector<16x128xf32>,
    return
  }
}

module attributes {stable_mosaic.version = 11 : i64} {
  func.func @_layer_edge_kernel(%arg0: i32, %arg1: memref<8x128xf32, #tpu.memory_space<vmem>>, %arg2: memref<8x16x128xf32, #tpu.memory_space<vmem>>, %arg3: memref<8x16xf32, #tpu.memory_space<vmem>>, %arg4: memref<8x128xf32, #tpu.memory_space<vmem>>, %arg5: memref<8x128xf32, #tpu.memory_space<vmem>>, %arg6: memref<16x128xf32, #tpu.memory_space<vmem>>, %arg7: memref<16x128xf32, #tpu.memory_space<vmem>>, %arg8: memref<128x128xbf16, #tpu.memory_space<vmem>>, %arg9: memref<1x128xf32, #tpu.memory_space<vmem>>, %arg10: memref<1x128xf32, #tpu.memory_space<vmem>>, %arg11: memref<1x128xf32, #tpu.memory_space<vmem>>, %arg12: memref<1x128xf32, #tpu.memory_space<vmem>>, %arg13: memref<1x128xf32, #tpu.memory_space<vmem>>, %arg14: memref<8x128xf32, #tpu.memory_space<vmem>>, %arg15: memref<8x16x128xf32, #tpu.memory_space<vmem>>) attributes {dimension_semantics = [#tpu.dimension_semantics<parallel>], iteration_bounds = array<i64: 2>, scalar_prefetch = 0 : i64, scratch_operands = 0 : i64, tpu.core_type = #tpu.core_type<tc>, window_params = [{transform_indices = @transform_0, window_bounds = array<i64: 8, 128>}, {transform_indices = @transform_1, window_bounds = array<i64: 8, 16, 128>}, {transform_indices = @transform_2, window_bounds = array<i64: 8, 16>}, {transform_indices = @transform_3, window_bounds = array<i64: 8, 128>}, {transform_indices = @transform_4, window_bounds = array<i64: 8, 128>}, {pipeline_mode = #tpu.pipeline_mode<synchronous>, transform_indices = @transform_5, window_bounds = array<i64: 16, 128>}, {pipeline_mode = #tpu.pipeline_mode<synchronous>, transform_indices = @transform_6, window_bounds = array<i64: 16, 128>}, {pipeline_mode = #tpu.pipeline_mode<synchronous>, transform_indices = @transform_7, window_bounds = array<i64: 128, 128>}, {pipeline_mode = #tpu.pipeline_mode<synchronous>, transform_indices = @transform_8, window_bounds = array<i64: 1, 128>}, {pipeline_mode = #tpu.pipeline_mode<synchronous>, transform_indices = @transform_9, window_bounds = array<i64: 1, 128>}, {pipeline_mode = #tpu.pipeline_mode<synchronous>, transform_indices = @transform_10, window_bounds = array<i64: 1, 128>}, {pipeline_mode = #tpu.pipeline_mode<synchronous>, transform_indices = @transform_11, window_bounds = array<i64: 1, 128>}, {pipeline_mode = #tpu.pipeline_mode<synchronous>, transform_indices = @transform_12, window_bounds = array<i64: 1, 128>}, {transform_indices = @transform_13, window_bounds = array<i64: 8, 128>}, {transform_indices = @transform_14, window_bounds = array<i64: 8, 16, 128>}]} {
    %c0 = arith.constant 0 : index
    %c0_0 = arith.constant 0 : index
    %c0_1 = arith.constant 0 : index
    %0 = vector.load %arg2[%c0, %c0_0, %c0_1] : memref<8x16x128xf32, #tpu.memory_space<vmem>>, vector<8x16x128xf32>
    %1 = vector.shape_cast %0 : vector<8x16x128xf32> to vector<128x128xf32>
    %2 = arith.truncf %1 : vector<128x128xf32> to vector<128x128xbf16>
    %c0_2 = arith.constant 0 : index
    %c0_3 = arith.constant 0 : index
    %3 = vector.load %arg8[%c0_2, %c0_3] : memref<128x128xbf16, #tpu.memory_space<vmem>>, vector<128x128xbf16>
    %cst = arith.constant dense<0.000000e+00> : vector<128x128xf32>
    %4 = tpu.matmul %2, %3, %cst {dimension_numbers = #tpu.dot_dimension_numbers<[1], [0], [0], [1], [0, 0, 1, 1], [], []>} : vector<128x128xbf16>, vector<128x128xbf16>, vector<128x128xf32> -> vector<128x128xf32>
    %c0_4 = arith.constant 0 : index
    %c0_5 = arith.constant 0 : index
    %5 = vector.load %arg9[%c0_4, %c0_5] : memref<1x128xf32, #tpu.memory_space<vmem>>, vector<1x128xf32>
    %6 = vector.broadcast %5 : vector<1x128xf32> to vector<128x128xf32>
    %7 = arith.addf %4, %6 : vector<128x128xf32>
    %8 = vector.shape_cast %7 : vector<128x128xf32> to vector<8x16x128xf32>
    %c0_6 = arith.constant 0 : index
    %c0_7 = arith.constant 0 : index
    %9 = vector.load %arg7[%c0_6, %c0_7] : memref<16x128xf32, #tpu.memory_space<vmem>>, vector<16x128xf32>
    %10 = vector.shape_cast %9 : vector<16x128xf32> to vector<1x16x128xf32>
    %11 = vector.broadcast %10 : vector<1x16x128xf32> to vector<8x16x128xf32>
    %12 = arith.addf %8, %11 : vector<8x16x128xf32>
    %c0_8 = arith.constant 0 : index
    %c0_9 = arith.constant 0 : index
    %13 = vector.load %arg5[%c0_8, %c0_9] : memref<8x128xf32, #tpu.memory_space<vmem>>, vector<8x128xf32>
    %14 = vector.shape_cast %13 : vector<8x128xf32> to vector<8x1x128xf32>
    %15 = vector.broadcast %14 : vector<8x1x128xf32> to vector<8x16x128xf32>
    %16 = arith.addf %12, %15 : vector<8x16x128xf32>
    %17 = arith.negf %16 : vector<8x16x128xf32>
    %18 = math.exp %17 : vector<8x16x128xf32>
    %cst_10 = arith.constant 1.000000e+00 : f32
    %19 = vector.broadcast %cst_10 : f32 to vector<8x16x128xf32>
    %20 = arith.addf %19, %18 : vector<8x16x128xf32>
    %21 = arith.divf %19, %20 : vector<8x16x128xf32>
    %c0_11 = arith.constant 0 : index
    %c0_12 = arith.constant 0 : index
    %22 = vector.load %arg3[%c0_11, %c0_12] : memref<8x16xf32, #tpu.memory_space<vmem>>, vector<8x16xf32>
    %23 = vector.shape_cast %22 : vector<8x16xf32> to vector<8x16x1xf32>
    %24 = vector.broadcast %23 : vector<8x16x1xf32> to vector<8x16x128xf32>
    %25 = arith.mulf %21, %24 : vector<8x16x128xf32>
    %c0_13 = arith.constant 0 : index
    %c0_14 = arith.constant 0 : index
    %26 = vector.load %arg6[%c0_13, %c0_14] : memref<16x128xf32, #tpu.memory_space<vmem>>, vector<16x128xf32>
    %27 = vector.shape_cast %26 : vector<16x128xf32> to vector<1x16x128xf32>
    %28 = vector.broadcast %27 : vector<1x16x128xf32> to vector<8x16x128xf32>
    %29 = arith.mulf %25, %28 : vector<8x16x128xf32>
    %cst_15 = arith.constant dense<0.000000e+00> : vector<8x128xf32>
    %30 = vector.multi_reduction <add>, %29, %cst_15 [1] : vector<8x16x128xf32> to vector<8x128xf32>
    %cst_16 = arith.constant dense<0.000000e+00> : vector<8x128xf32>
    %31 = vector.multi_reduction <add>, %25, %cst_16 [1] : vector<8x16x128xf32> to vector<8x128xf32>
    %c0_17 = arith.constant 0 : index
    %c0_18 = arith.constant 0 : index
    %32 = vector.load %arg4[%c0_17, %c0_18] : memref<8x128xf32, #tpu.memory_space<vmem>>, vector<8x128xf32>
    %cst_19 = arith.constant 9.99999997E-7 : f32
    %33 = vector.broadcast %cst_19 : f32 to vector<8x128xf32>
    %34 = arith.addf %31, %33 : vector<8x128xf32>
    %35 = tpu.reciprocal %34 {approx = true} : vector<8x128xf32> -> vector<8x128xf32>
    %36 = arith.mulf %30, %35 : vector<8x128xf32>
    %37 = arith.addf %32, %36 : vector<8x128xf32>
    %c0_20 = arith.constant 0 : index
    %c0_21 = arith.constant 0 : index
    %38 = vector.load %arg10[%c0_20, %c0_21] : memref<1x128xf32, #tpu.memory_space<vmem>>, vector<1x128xf32>
    %39 = vector.broadcast %38 : vector<1x128xf32> to vector<8x128xf32>
    %40 = arith.mulf %39, %37 : vector<8x128xf32>
    %c0_22 = arith.constant 0 : index
    %c0_23 = arith.constant 0 : index
    %41 = vector.load %arg11[%c0_22, %c0_23] : memref<1x128xf32, #tpu.memory_space<vmem>>, vector<1x128xf32>
    %42 = vector.broadcast %41 : vector<1x128xf32> to vector<8x128xf32>
    %43 = arith.addf %40, %42 : vector<8x128xf32>
    %cst_24 = arith.constant 0.000000e+00 : f32
    %44 = vector.broadcast %cst_24 : f32 to vector<8x128xf32>
    %45 = arith.maximumf %43, %44 : vector<8x128xf32>
    %c0_25 = arith.constant 0 : index
    %c0_26 = arith.constant 0 : index
    %46 = vector.load %arg12[%c0_25, %c0_26] : memref<1x128xf32, #tpu.memory_space<vmem>>, vector<1x128xf32>
    %47 = vector.shape_cast %46 : vector<1x128xf32> to vector<1x1x128xf32>
    %48 = vector.broadcast %47 : vector<1x1x128xf32> to vector<8x16x128xf32>
    %49 = arith.mulf %48, %16 : vector<8x16x128xf32>
    %c0_27 = arith.constant 0 : index
    %c0_28 = arith.constant 0 : index
    %50 = vector.load %arg13[%c0_27, %c0_28] : memref<1x128xf32, #tpu.memory_space<vmem>>, vector<1x128xf32>
    %51 = vector.shape_cast %50 : vector<1x128xf32> to vector<1x1x128xf32>
    %52 = vector.broadcast %51 : vector<1x1x128xf32> to vector<8x16x128xf32>
    %53 = arith.addf %49, %52 : vector<8x16x128xf32>
    %cst_29 = arith.constant 0.000000e+00 : f32
    %54 = vector.broadcast %cst_29 : f32 to vector<8x16x128xf32>
    %55 = arith.maximumf %53, %54 : vector<8x16x128xf32>
    %c0_30 = arith.constant 0 : index
    %c0_31 = arith.constant 0 : index
    %56 = vector.load %arg1[%c0_30, %c0_31] : memref<8x128xf32, #tpu.memory_space<vmem>>, vector<8x128xf32>
    %57 = arith.addf %56, %45 : vector<8x128xf32>
    %c0_32 = arith.constant 0 : index
    %c0_33 = arith.constant 0 : index
    %58 = vector.load %arg14[%c0_32, %c0_33] : memref<8x128xf32, #tpu.memory_space<vmem>>, vector<8x128xf32>
    tpu.vector_store %arg14[%c0_32, %c0_33], %57 {strides = array<i32>} : memref<8x128xf32, #tpu.memory_space<vmem>>, vector<8x128xf32>,
    %59 = arith.addf %0, %55 : vector<8x16x128xf32>
    %c0_34 = arith.constant 0 : index
    %c0_35 = arith.constant 0 : index
    %c0_36 = arith.constant 0 : index
    %60 = vector.load %arg15[%c0_34, %c0_35, %c0_36] : memref<8x16x128xf32, #tpu.memory_space<vmem>>, vector<8x16x128xf32>
    tpu.vector_store %arg15[%c0_34, %c0_35, %c0_36], %59 {strides = array<i32>} : memref<8x16x128xf32, #tpu.memory_space<vmem>>, vector<8x16x128xf32>,
    return
  }
  func.func @transform_0(%arg0: i32) -> (i32, i32) {
    %c0_i32 = arith.constant 0 : i32
    %c0_i32_0 = arith.constant 0 : i32
    return %arg0, %c0_i32 : i32, i32
  }
  func.func @transform_1(%arg0: i32) -> (i32, i32, i32) {
    %c0_i32 = arith.constant 0 : i32
    %c0_i32_0 = arith.constant 0 : i32
    %c0_i32_1 = arith.constant 0 : i32
    return %arg0, %c0_i32, %c0_i32_0 : i32, i32, i32
  }
  func.func @transform_2(%arg0: i32) -> (i32, i32) {
    %c0_i32 = arith.constant 0 : i32
    %c0_i32_0 = arith.constant 0 : i32
    return %arg0, %c0_i32 : i32, i32
  }
  func.func @transform_3(%arg0: i32) -> (i32, i32) {
    %c0_i32 = arith.constant 0 : i32
    %c0_i32_0 = arith.constant 0 : i32
    return %arg0, %c0_i32 : i32, i32
  }
  func.func @transform_4(%arg0: i32) -> (i32, i32) {
    %c0_i32 = arith.constant 0 : i32
    %c0_i32_0 = arith.constant 0 : i32
    return %arg0, %c0_i32 : i32, i32
  }
  func.func @transform_5(%arg0: i32) -> (i32, i32) {
    %c0_i32 = arith.constant 0 : i32
    %c0_i32_0 = arith.constant 0 : i32
    %c0_i32_1 = arith.constant 0 : i32
    return %c0_i32, %c0_i32_0 : i32, i32
  }
  func.func @transform_6(%arg0: i32) -> (i32, i32) {
    %c0_i32 = arith.constant 0 : i32
    %c0_i32_0 = arith.constant 0 : i32
    %c0_i32_1 = arith.constant 0 : i32
    return %c0_i32, %c0_i32_0 : i32, i32
  }
  func.func @transform_7(%arg0: i32) -> (i32, i32) {
    %c0_i32 = arith.constant 0 : i32
    %c0_i32_0 = arith.constant 0 : i32
    %c0_i32_1 = arith.constant 0 : i32
    return %c0_i32, %c0_i32_0 : i32, i32
  }
  func.func @transform_8(%arg0: i32) -> (i32, i32) {
    %c0_i32 = arith.constant 0 : i32
    %c0_i32_0 = arith.constant 0 : i32
    %c0_i32_1 = arith.constant 0 : i32
    return %c0_i32, %c0_i32_0 : i32, i32
  }
  func.func @transform_9(%arg0: i32) -> (i32, i32) {
    %c0_i32 = arith.constant 0 : i32
    %c0_i32_0 = arith.constant 0 : i32
    %c0_i32_1 = arith.constant 0 : i32
    return %c0_i32, %c0_i32_0 : i32, i32
  }
  func.func @transform_10(%arg0: i32) -> (i32, i32) {
    %c0_i32 = arith.constant 0 : i32
    %c0_i32_0 = arith.constant 0 : i32
    %c0_i32_1 = arith.constant 0 : i32
    return %c0_i32, %c0_i32_0 : i32, i32
  }
  func.func @transform_11(%arg0: i32) -> (i32, i32) {
    %c0_i32 = arith.constant 0 : i32
    %c0_i32_0 = arith.constant 0 : i32
    %c0_i32_1 = arith.constant 0 : i32
    return %c0_i32, %c0_i32_0 : i32, i32
  }
  func.func @transform_12(%arg0: i32) -> (i32, i32) {
    %c0_i32 = arith.constant 0 : i32
    %c0_i32_0 = arith.constant 0 : i32
    %c0_i32_1 = arith.constant 0 : i32
    return %c0_i32, %c0_i32_0 : i32, i32
  }
  func.func @transform_13(%arg0: i32) -> (i32, i32) {
    %c0_i32 = arith.constant 0 : i32
    %c0_i32_0 = arith.constant 0 : i32
    return %arg0, %c0_i32 : i32, i32
  }
  func.func @transform_14(%arg0: i32) -> (i32, i32, i32) {
    %c0_i32 = arith.constant 0 : i32
    %c0_i32_0 = arith.constant 0 : i32
    %c0_i32_1 = arith.constant 0 : i32
    return %arg0, %c0_i32, %c0_i32_0 : i32, i32, i32
  }
}

module attributes {stable_mosaic.version = 11 : i64} {
  func.func @_node_proj_kernel(%arg0: memref<16x128xf32, #tpu.memory_space<vmem>>, %arg1: memref<128x128xbf16, #tpu.memory_space<vmem>>, %arg2: memref<1x128xf32, #tpu.memory_space<vmem>>, %arg3: memref<128x128xbf16, #tpu.memory_space<vmem>>, %arg4: memref<1x128xf32, #tpu.memory_space<vmem>>, %arg5: memref<128x128xbf16, #tpu.memory_space<vmem>>, %arg6: memref<1x128xf32, #tpu.memory_space<vmem>>, %arg7: memref<128x128xbf16, #tpu.memory_space<vmem>>, %arg8: memref<1x128xf32, #tpu.memory_space<vmem>>, %arg9: memref<16x128xf32, #tpu.memory_space<vmem>>, %arg10: memref<16x128xf32, #tpu.memory_space<vmem>>, %arg11: memref<16x128xf32, #tpu.memory_space<vmem>>, %arg12: memref<16x128xf32, #tpu.memory_space<vmem>>) attributes {dimension_semantics = [], scalar_prefetch = 0 : i64, scratch_operands = 0 : i64, tpu.core_type = #tpu.core_type<tc>} {
    %c0 = arith.constant 0 : index
    %c0_0 = arith.constant 0 : index
    %0 = vector.load %arg0[%c0, %c0_0] : memref<16x128xf32, #tpu.memory_space<vmem>>, vector<16x128xf32>
    %1 = arith.truncf %0 : vector<16x128xf32> to vector<16x128xbf16>
    %c0_1 = arith.constant 0 : index
    %c0_2 = arith.constant 0 : index
    %2 = vector.load %arg1[%c0_1, %c0_2] : memref<128x128xbf16, #tpu.memory_space<vmem>>, vector<128x128xbf16>
    %cst = arith.constant dense<0.000000e+00> : vector<16x128xf32>
    %3 = tpu.matmul %1, %2, %cst {dimension_numbers = #tpu.dot_dimension_numbers<[1], [0], [0], [1], [0, 0, 1, 1], [], []>} : vector<16x128xbf16>, vector<128x128xbf16>, vector<16x128xf32> -> vector<16x128xf32>
    %c0_3 = arith.constant 0 : index
    %c0_4 = arith.constant 0 : index
    %4 = vector.load %arg2[%c0_3, %c0_4] : memref<1x128xf32, #tpu.memory_space<vmem>>, vector<1x128xf32>
    %5 = vector.broadcast %4 : vector<1x128xf32> to vector<16x128xf32>
    %6 = arith.addf %3, %5 : vector<16x128xf32>
    %c0_5 = arith.constant 0 : index
    %c0_6 = arith.constant 0 : index
    %7 = vector.load %arg9[%c0_5, %c0_6] : memref<16x128xf32, #tpu.memory_space<vmem>>, vector<16x128xf32>
    tpu.vector_store %arg9[%c0_5, %c0_6], %6 {strides = array<i32>} : memref<16x128xf32, #tpu.memory_space<vmem>>, vector<16x128xf32>,
    %c0_7 = arith.constant 0 : index
    %c0_8 = arith.constant 0 : index
    %8 = vector.load %arg3[%c0_7, %c0_8] : memref<128x128xbf16, #tpu.memory_space<vmem>>, vector<128x128xbf16>
    %cst_9 = arith.constant dense<0.000000e+00> : vector<16x128xf32>
    %9 = tpu.matmul %1, %8, %cst_9 {dimension_numbers = #tpu.dot_dimension_numbers<[1], [0], [0], [1], [0, 0, 1, 1], [], []>} : vector<16x128xbf16>, vector<128x128xbf16>, vector<16x128xf32> -> vector<16x128xf32>
    %c0_10 = arith.constant 0 : index
    %c0_11 = arith.constant 0 : index
    %10 = vector.load %arg4[%c0_10, %c0_11] : memref<1x128xf32, #tpu.memory_space<vmem>>, vector<1x128xf32>
    %11 = vector.broadcast %10 : vector<1x128xf32> to vector<16x128xf32>
    %12 = arith.addf %9, %11 : vector<16x128xf32>
    %c0_12 = arith.constant 0 : index
    %c0_13 = arith.constant 0 : index
    %13 = vector.load %arg10[%c0_12, %c0_13] : memref<16x128xf32, #tpu.memory_space<vmem>>, vector<16x128xf32>
    tpu.vector_store %arg10[%c0_12, %c0_13], %12 {strides = array<i32>} : memref<16x128xf32, #tpu.memory_space<vmem>>, vector<16x128xf32>,
    %c0_14 = arith.constant 0 : index
    %c0_15 = arith.constant 0 : index
    %14 = vector.load %arg5[%c0_14, %c0_15] : memref<128x128xbf16, #tpu.memory_space<vmem>>, vector<128x128xbf16>
    %cst_16 = arith.constant dense<0.000000e+00> : vector<16x128xf32>
    %15 = tpu.matmul %1, %14, %cst_16 {dimension_numbers = #tpu.dot_dimension_numbers<[1], [0], [0], [1], [0, 0, 1, 1], [], []>} : vector<16x128xbf16>, vector<128x128xbf16>, vector<16x128xf32> -> vector<16x128xf32>
    %c0_17 = arith.constant 0 : index
    %c0_18 = arith.constant 0 : index
    %16 = vector.load %arg6[%c0_17, %c0_18] : memref<1x128xf32, #tpu.memory_space<vmem>>, vector<1x128xf32>
    %17 = vector.broadcast %16 : vector<1x128xf32> to vector<16x128xf32>
    %18 = arith.addf %15, %17 : vector<16x128xf32>
    %c0_19 = arith.constant 0 : index
    %c0_20 = arith.constant 0 : index
    %19 = vector.load %arg11[%c0_19, %c0_20] : memref<16x128xf32, #tpu.memory_space<vmem>>, vector<16x128xf32>
    tpu.vector_store %arg11[%c0_19, %c0_20], %18 {strides = array<i32>} : memref<16x128xf32, #tpu.memory_space<vmem>>, vector<16x128xf32>,
    %c0_21 = arith.constant 0 : index
    %c0_22 = arith.constant 0 : index
    %20 = vector.load %arg7[%c0_21, %c0_22] : memref<128x128xbf16, #tpu.memory_space<vmem>>, vector<128x128xbf16>
    %cst_23 = arith.constant dense<0.000000e+00> : vector<16x128xf32>
    %21 = tpu.matmul %1, %20, %cst_23 {dimension_numbers = #tpu.dot_dimension_numbers<[1], [0], [0], [1], [0, 0, 1, 1], [], []>} : vector<16x128xbf16>, vector<128x128xbf16>, vector<16x128xf32> -> vector<16x128xf32>
    %c0_24 = arith.constant 0 : index
    %c0_25 = arith.constant 0 : index
    %22 = vector.load %arg8[%c0_24, %c0_25] : memref<1x128xf32, #tpu.memory_space<vmem>>, vector<1x128xf32>
    %23 = vector.broadcast %22 : vector<1x128xf32> to vector<16x128xf32>
    %24 = arith.addf %21, %23 : vector<16x128xf32>
    %c0_26 = arith.constant 0 : index
    %c0_27 = arith.constant 0 : index
    %25 = vector.load %arg12[%c0_26, %c0_27] : memref<16x128xf32, #tpu.memory_space<vmem>>, vector<16x128xf32>
    tpu.vector_store %arg12[%c0_26, %c0_27], %24 {strides = array<i32>} : memref<16x128xf32, #tpu.memory_space<vmem>>, vector<16x128xf32>,
    return
  }
}

module attributes {stable_mosaic.version = 11 : i64} {
  func.func @_linear_kernel(%arg0: memref<16x128xf32, #tpu.memory_space<vmem>>, %arg1: memref<128x16xbf16, #tpu.memory_space<vmem>>, %arg2: memref<1x16xf32, #tpu.memory_space<vmem>>, %arg3: memref<16x16xf32, #tpu.memory_space<vmem>>) attributes {dimension_semantics = [], scalar_prefetch = 0 : i64, scratch_operands = 0 : i64, tpu.core_type = #tpu.core_type<tc>} {
    %c0 = arith.constant 0 : index
    %c0_0 = arith.constant 0 : index
    %0 = vector.load %arg0[%c0, %c0_0] : memref<16x128xf32, #tpu.memory_space<vmem>>, vector<16x128xf32>
    %1 = arith.truncf %0 : vector<16x128xf32> to vector<16x128xbf16>
    %c0_1 = arith.constant 0 : index
    %c0_2 = arith.constant 0 : index
    %2 = vector.load %arg1[%c0_1, %c0_2] : memref<128x16xbf16, #tpu.memory_space<vmem>>, vector<128x16xbf16>
    %cst = arith.constant dense<0.000000e+00> : vector<16x16xf32>
    %3 = tpu.matmul %1, %2, %cst {dimension_numbers = #tpu.dot_dimension_numbers<[1], [0], [0], [1], [0, 0, 1, 1], [], []>} : vector<16x128xbf16>, vector<128x16xbf16>, vector<16x16xf32> -> vector<16x16xf32>
    %c0_3 = arith.constant 0 : index
    %c0_4 = arith.constant 0 : index
    %4 = vector.load %arg2[%c0_3, %c0_4] : memref<1x16xf32, #tpu.memory_space<vmem>>, vector<1x16xf32>
    %5 = vector.broadcast %4 : vector<1x16xf32> to vector<16x16xf32>
    %6 = arith.addf %3, %5 : vector<16x16xf32>
    %c0_5 = arith.constant 0 : index
    %c0_6 = arith.constant 0 : index
    %7 = vector.load %arg3[%c0_5, %c0_6] : memref<16x16xf32, #tpu.memory_space<vmem>>, vector<16x16xf32>
    tpu.vector_store %arg3[%c0_5, %c0_6], %6 {strides = array<i32>} : memref<16x16xf32, #tpu.memory_space<vmem>>, vector<16x16xf32>,
    return
  }
}

</mosaic_0001>

<bundles_post_ra>
// kernel: encoder_forward.7
= control target key start
LH: loop header
LB: loop body
LE: loop exit
PB: predicated region body
PF: predicated region fallthrough
CT: control target
= control target key end

     0   :  { %vm30_vm0 = vcmask 1043456   ;;  %v93_v0 = vmov 0.0   ;;  %vm94_vm1 = vmmov 0   ;;  %vm26_vm2 = vcmask 64512   ;;  %s133_s1 = inlined_call_operand.vmem [shape: bf16[8,128], index: 1, kind: input, shape index: {}]   ;;  %s134_s0 = inlined_call_operand.vmem [shape: f32[16,8], index: 0, kind: input, shape index: {}]   ;;  %s135_s2 = inlined_call_operand.vmem [shape: f32[1,128], index: 2, kind: input, shape index: {}]   ;;  %s136_s3 = inlined_call_operand.vmem [shape: f32[16,128], index: 3, kind: output, shape index: {}]  }
   0x1   :  { %85 = vmatprep.subr.bf16.mxu0 %v93_v0  ;;  %v18_v1 = vld [vmem:[%s133_s1] sm:$0xf]  ;;  %87 = vmatprep.mubr.msk.bf16.mxu0 %vm94_vm1, %v93_v0  ;;  %v16_v3 = vld [vmem:[%s134_s0 + $0x8] sm:$0xff] }
   0x2   :  { %v15_v2 = vld [vmem:[%s134_s0] sm:$0xff]  ;;  %v32_v4 = vsel %vm30_vm0, %v18_v1, 0 }
   0x3   :  { %v17_v5 = vpack.c.bf16 %v16_v3, %v15_v2  ;;  %86 = vmatpush3.bf16.msra.mxu0 %v32_v4  ;;  %v81_v6 = vld [vmem:[%s135_s2] ss:$0 sm:$0xff] }
   0x6   :  { %88 = vmatmul.mubr.msk.bf16.vlgmr.msra.gmra.mxu0 %vm26_vm2, %v17_v5 }
  0xc6   :  { %v68_v7 = vpop.f32.mrf.mxu0 }
  0xc7   :  { %v69_v8 = vadd.f32 %v81_v6, %v68_v7 }
  0xc8   :  { %v89_v9 = vpop.f32.mrf.mxu0 }
  0xc9   :  { %75 = vst [vmem:[%s136_s3] sm:$0xff] %v69_v8 }
  0xca   :  { %v71_v10 = vpop.f32.mrf.mxu0 }
  0xcb   :  { %v72_v11 = vadd.f32 %v81_v6, %v71_v10 }
  0xcc   :  { %v90_v12 = vpop.f32.mrf.mxu0 }
  0xcd   :  { %76 = vst [vmem:[%s136_s3 + $0x8] sm:$0xff] %v72_v11 }

// kernel: encoder_forward.8
= control target key start
LH: loop header
LB: loop body
LE: loop exit
PB: predicated region body
PF: predicated region fallthrough
CT: control target
= control target key end

     0   :  { %s430_s12 = smov 0   ;;  %s512_s0 = inlined_call_operand.vmem [shape: f32[16,16], index: 0, kind: input, shape index: {}]   ;;  %s513_s1 = inlined_call_operand.vmem [shape: f32[1,128], index: 1, kind: input, shape index: {}]   ;;  %s514_s2 = inlined_call_operand.vmem [shape: f32[1,128], index: 2, kind: input, shape index: {}]   ;;  %s515_s3 = inlined_call_operand.vmem [shape: f32[16,16,128], index: 3, kind: output, shape index: {}]  }
   0x1 LB: > { %s436_s13 = sadd.s32 4294967295, %s408_s12   ;;  %p384_p0 = scmp.ge.s32.totalorder %s408_s12, 1  ;;  %s408_s12 = sphi %s430_s12, %s13_s12  }
   0x2   : > { %p136_p1 = scmp.lt.s32.totalorder %s408_s12, 3 }
   0x4   : > { %p137_p2 = pnand %p384_p0, %p136_p1 }
   0x5   : > { %p160_p3 = scmp.lt.s32.totalorder (!%p137_p2), %s436_s13, 1  ;;  %s386_s19 = sshll.u32 (!%p137_p2), %s436_s13, 3 }
   0x6   : > { %140 = sbr.rel (%p137_p2) target bundleno = 167 (0xa7), region = 32  ;;  %p165_p4 = scmp.lt.s32.totalorder (!%p137_p2), %s386_s19, 15 }
   0xb   : > { %v172_v0 = vlaneseq  ;;  %s161_s14 = scalar_select %p160_p3, %s436_s13, 1  ;;  %v449_v19 = vld [vmem:[%s513_s1] ss:$0 sm:$0xff] }
   0xc   : > { %s517_s19 = smov (!%p165_p4, %s386_s19), 15  ;;  %v454_v20 = vld [vmem:[%s514_s2] ss:$0 sm:$0xff] }
   0xd   : > { %v173_v1 = vshrl.u32 %v172_v0, 7  ;;  %s385_s15 = sshll.u32 %s161_s14, 3  ;;  %s393_s22 = sshll.u32 %s517_s19, 4 }
   0xe   : > { %s163_s18 = scalar_lea.vmem %s512_s0, %s385_s15  ;;  %s461_s27 = scalar_lea.vmem %s515_s3, %s393_s22 }
   0xf   : > { %v185_v2 = vsub.s32 1, %v173_v1  ;;  %v174_v3 = vsub.s32 0, %v173_v1  ;;  %v171_v4 = vld [vmem:[%s163_s18] sm:$0xff]  ;;  %v196_v7 = vsub.s32 2, %v173_v1  ;;  %v207_v9 = vsub.s32 3, %v173_v1 }
  0x10   : > { %v218_v11 = vsub.s32 4, %v173_v1  ;;  %v229_v13 = vsub.s32 5, %v173_v1  ;;  %v240_v15 = vsub.s32 6, %v173_v1  ;;  %v251_v17 = vsub.s32 7, %v173_v1 }
  0x11   : > { %v186_v5 = vrot.slane %v171_v4, %v185_v2  ;;  %v175_v6 = vrot.slane %v171_v4, %v174_v3  ;;  %v197_v8 = vrot.slane %v171_v4, %v196_v7  ;;  %v208_v10 = vrot.slane %v171_v4, %v207_v9 }
  0x12   : > { %v219_v12 = vrot.slane %v171_v4, %v218_v11  ;;  %v230_v14 = vrot.slane %v171_v4, %v229_v13  ;;  %v241_v16 = vrot.slane %v171_v4, %v240_v15  ;;  %v252_v18 = vrot.slane %v171_v4, %v251_v17 }
  0x13   : > { %188 = vbcast.lane.b32.xlu1 %v186_v5, 256  ;;  %177 = vbcast.lane.b32.xlu0 %v175_v6, 256 }
  0x17   : > { %192 = vbcast.lane.b32.xlu1 %v186_v5, 264  ;;  %181 = vbcast.lane.b32.xlu0 %v175_v6, 264 }
  0x1b   : > { %203 = vbcast.lane.b32.xlu1 %v197_v8, 264  ;;  %199 = vbcast.lane.b32.xlu0 %v197_v8, 256 }
  0x1f   : > { %214 = vbcast.lane.b32.xlu1 %v208_v10, 264  ;;  %210 = vbcast.lane.b32.xlu0 %v208_v10, 256 }
  0x23   : > { %225 = vbcast.lane.b32.xlu1 %v219_v12, 264  ;;  %221 = vbcast.lane.b32.xlu0 %v219_v12, 256 }
  0x27   : > { %236 = vbcast.lane.b32.xlu1 %v230_v14, 264  ;;  %232 = vbcast.lane.b32.xlu0 %v230_v14, 256 }
  0x2b   : > { %247 = vbcast.lane.b32.xlu1 %v241_v16, 264  ;;  %243 = vbcast.lane.b32.xlu0 %v241_v16, 256 }
  0x2f   : > { %258 = vbcast.lane.b32.xlu1 %v252_v18, 264  ;;  %254 = vbcast.lane.b32.xlu0 %v252_v18, 256 }
  0x85   : > { %v189_v21 = vpop.permute.xlu1 %188  ;;  %v178_v22 = vpop.permute.xlu0 %177 }
  0x86   : > { %v269_v23 = vmul.f32 %v449_v19, %v189_v21  ;;  %v267_v24 = vmul.f32 %v449_v19, %v178_v22 }
  0x88   : > { %v292_v25 = vadd.f32 %v454_v20, %v269_v23  ;;  %v290_v26 = vadd.f32 %v454_v20, %v267_v24 }
  0x89   : > { %v193_v27 = vpop.permute.xlu1 %192  ;;  %v182_v28 = vpop.permute.xlu0 %181 }
  0x8a   : > { %308 = vst [vmem:[%s461_s27 + $0x10] sm:$0xff] %v292_v25  ;;  %306 = vst [vmem:[%s461_s27] sm:$0xff] %v290_v26  ;;  %v270_v29 = vmul.f32 %v449_v19, %v193_v27  ;;  %v268_v30 = vmul.f32 %v449_v19, %v182_v28 }
  0x8c   : > { %v293_v31 = vadd.f32 %v454_v20, %v270_v29  ;;  %v291_v32 = vadd.f32 %v454_v20, %v268_v30 }
  0x8d   : > { %v204_v33 = vpop.permute.xlu1 %203  ;;  %v200_v34 = vpop.permute.xlu0 %199 }
  0x8e   : > { %309 = vst [vmem:[%s461_s27 + $0x18] sm:$0xff] %v293_v31  ;;  %307 = vst [vmem:[%s461_s27 + $0x8] sm:$0xff] %v291_v32  ;;  %v272_v35 = vmul.f32 %v449_v19, %v204_v33  ;;  %v271_v36 = vmul.f32 %v449_v19, %v200_v34 }
  0x90   : > { %v295_v37 = vadd.f32 %v454_v20, %v272_v35  ;;  %v294_v38 = vadd.f32 %v454_v20, %v271_v36 }
  0x91   : > { %v215_v39 = vpop.permute.xlu1 %214  ;;  %v211_v40 = vpop.permute.xlu0 %210 }
  0x92   : > { %311 = vst [vmem:[%s461_s27 + $0x28] sm:$0xff] %v295_v37  ;;  %310 = vst [vmem:[%s461_s27 + $0x20] sm:$0xff] %v294_v38  ;;  %v274_v41 = vmul.f32 %v449_v19, %v215_v39  ;;  %v273_v42 = vmul.f32 %v449_v19, %v211_v40 }
  0x94   : > { %v297_v43 = vadd.f32 %v454_v20, %v274_v41  ;;  %v296_v44 = vadd.f32 %v454_v20, %v273_v42 }
  0x95   : > { %v226_v45 = vpop.permute.xlu1 %225  ;;  %v222_v46 = vpop.permute.xlu0 %221 }
  0x96   : > { %313 = vst [vmem:[%s461_s27 + $0x38] sm:$0xff] %v297_v43  ;;  %312 = vst [vmem:[%s461_s27 + $0x30] sm:$0xff] %v296_v44  ;;  %v276_v47 = vmul.f32 %v449_v19, %v226_v45  ;;  %v275_v48 = vmul.f32 %v449_v19, %v222_v46 }
  0x98   : > { %v299_v49 = vadd.f32 %v454_v20, %v276_v47  ;;  %v298_v50 = vadd.f32 %v454_v20, %v275_v48 }
  0x99   : > { %v237_v51 = vpop.permute.xlu1 %236  ;;  %v233_v52 = vpop.permute.xlu0 %232 }
  0x9a   : > { %315 = vst [vmem:[%s461_s27 + $0x48] sm:$0xff] %v299_v49  ;;  %314 = vst [vmem:[%s461_s27 + $0x40] sm:$0xff] %v298_v50  ;;  %v278_v53 = vmul.f32 %v449_v19, %v237_v51  ;;  %v277_v54 = vmul.f32 %v449_v19, %v233_v52 }
  0x9c   : > { %v301_v55 = vadd.f32 %v454_v20, %v278_v53  ;;  %v300_v56 = vadd.f32 %v454_v20, %v277_v54 }
  0x9d   : > { %v248_v57 = vpop.permute.xlu1 %247  ;;  %v244_v58 = vpop.permute.xlu0 %243 }
  0x9e   : > { %317 = vst [vmem:[%s461_s27 + $0x58] sm:$0xff] %v301_v55  ;;  %316 = vst [vmem:[%s461_s27 + $0x50] sm:$0xff] %v300_v56  ;;  %v280_v59 = vmul.f32 %v449_v19, %v248_v57  ;;  %v279_v60 = vmul.f32 %v449_v19, %v244_v58 }
  0xa0   : > { %v303_v61 = vadd.f32 %v454_v20, %v280_v59  ;;  %v302_v62 = vadd.f32 %v454_v20, %v279_v60 }
  0xa1   : > { %v259_v63 = vpop.permute.xlu1 %258  ;;  %v255_v0 = vpop.permute.xlu0 %254 }
  0xa2   : > { %319 = vst [vmem:[%s461_s27 + $0x68] sm:$0xff] %v303_v61  ;;  %318 = vst [vmem:[%s461_s27 + $0x60] sm:$0xff] %v302_v62  ;;  %v282_v1 = vmul.f32 %v449_v19, %v259_v63  ;;  %v281_v2 = vmul.f32 %v449_v19, %v255_v0 }
  0xa4   : > { %v305_v3 = vadd.f32 %v454_v20, %v282_v1  ;;  %v304_v4 = vadd.f32 %v454_v20, %v281_v2 }
  0xa6   : > { %321 = vst [vmem:[%s461_s27 + $0x78] sm:$0xff] %v305_v3  ;;  %320 = vst [vmem:[%s461_s27 + $0x70] sm:$0xff] %v304_v4 }
  0xa7 PF: > { %s13_s12 = sadd.s32 1, %s408_s12  }
  0xa8   : > { %p10_p5 = scmp.ge.s32.totalorder %s13_s12, 4  }
  0xaa   :  { %12 = sbr.rel (!%p10_p5) target bundleno = 1 (0x1), region = 62 }

// kernel: encoder_forward.9
= control target key start
LH: loop header
LB: loop body
LE: loop exit
PB: predicated region body
PF: predicated region fallthrough
CT: control target
= control target key end

     0   :  { %18 = vsyncpa [#allocation3], 0  ;;  %s997_s0 = inlined_call_operand.vmem [shape: f32[16,128], index: 0, kind: input, shape index: {}]   ;;  %s998_s1 = inlined_call_operand.vmem [shape: bf16[128,128], index: 1, kind: input, shape index: {}]   ;;  %s999_s2 = inlined_call_operand.vmem [shape: f32[1,128], index: 2, kind: input, shape index: {}]   ;;  %s1000_s3 = inlined_call_operand.hbm [shape: bf16[128,128], index: 3, kind: input, shape index: {}]   ;;  %s1001_s4 = inlined_call_operand.vmem [shape: f32[1,128], index: 4, kind: input, shape index: {}]   ;;  %s1002_s5 = inlined_call_operand.hbm [shape: bf16[128,128], index: 5, kind: input, shape index: {}]   ;;  %s1003_s6 = inlined_call_operand.vmem [shape: f32[1,128], index: 6, kind: input, shape index: {}]   ;;  %s1004_s7 = inlined_call_operand.hbm [shape: bf16[128,128], index: 7, kind: input, shape index: {}]   ;;  %s1005_s8 = inlined_call_operand.vmem [shape: f32[1,128], index: 8, kind: input, shape index: {}]   ;;  %s1006_s9 = inlined_call_operand.vmem [shape: f32[16,128], index: 9, kind: output, shape index: {0}]   ;;  %s1007_s10 = inlined_call_operand.vmem [shape: f32[16,128], index: 10, kind: output, shape index: {1}]   ;;  %s1008_s11 = inlined_call_operand.vmem [shape: f32[16,128], index: 11, kind: output, shape index: {2}]   ;;  %s1009_s12 = inlined_call_operand.vmem [shape: f32[16,128], index: 12, kind: output, shape index: {3}]  }
   0x1   :  { %19 = vsyncpa [#allocation5], 0  ;;  %s810_s21 = smov [#allocation4]   ;;  %s811_s23 = smov [#allocation2]  }
   0x2   :  { %s45_s22 = sshll.u32 %s810_s21, 4  ;;  %s31_s24 = sshll.u32 %s811_s23, 4  ;;  %s46_s22 = int_to_ptr.vmem [resolvable:$true] %s45_s22  ;;  %s32_s24 = int_to_ptr.vmem [resolvable:$true] %s31_s24 }
   0x3   :  { %s754_s25 = scalar_lea.vmem %s46_s22, 1024  ;;  %p759_p1 = scmp.lt.s32.totalorder %s46_s22, %s46_s22 }
   0x4   :  { %p755_p0 = scmp.ne.s32.totalorder %s46_s22, %s754_s25  ;;  %p760_p2 = scmp.lt.s32.totalorder %s754_s25, %s754_s25 }
   0x6   :  { %p761_p3 = por %p760_p2, %p759_p1 }
   0x8   :  { %p762_p4 = pnand %p761_p3, %p755_p0 }
   0xa   :  { %765 = shalt.err (!%p762_p4)
}
   0xb   :  { %s812_s26 = smov 64   ;;  %s813_s27 = smov 4  }
   0xc   :  { %51 = dma.hbm_to_vmem [thread:$0]  %s1002_s5, 1024, %s46_s22, [#allocation5], %s812_s26, %s812_s26, %s813_s27  }
   0xd   :  { %s774_s30 = scalar_lea.vmem %s32_s24, 1024  ;;  %p779_p6 = scmp.lt.s32.totalorder %s32_s24, %s32_s24 }
   0xe   :  { %p775_p5 = scmp.ne.s32.totalorder %s32_s24, %s774_s30  ;;  %p780_p7 = scmp.lt.s32.totalorder %s774_s30, %s774_s30 }
  0x10   :  { %p781_p8 = por %p780_p7, %p779_p6 }
  0x12   :  { %p782_p9 = pnand %p781_p8, %p775_p5 }
  0x14   :  { %785 = shalt.err (!%p782_p9)
}
  0x15   :  { %37 = dma.hbm_to_vmem [thread:$0]  %s1000_s3, 1024, %s32_s24, [#allocation3], %s812_s26, %s812_s26, %s813_s27  }
  0x16   :  { %s814_s15 = smov [#allocation6]  }
  0x17   :  { %s59_s16 = sshll.u32 %s814_s15, 4  ;;  %s60_s16 = int_to_ptr.vmem [resolvable:$true] %s59_s16 }
  0x18   :  { %s794_s17 = scalar_lea.vmem %s60_s16, 1024  ;;  %p799_p11 = scmp.lt.s32.totalorder %s60_s16, %s60_s16 }
  0x19   :  { %p795_p10 = scmp.ne.s32.totalorder %s60_s16, %s794_s17  ;;  %p800_p12 = scmp.lt.s32.totalorder %s794_s17, %s794_s17 }
  0x1b   :  { %p801_p13 = por %p800_p12, %p799_p11 }
  0x1d   :  { %p802_p0 = pnand %p801_p13, %p795_p10 }
  0x1f   :  { %805 = shalt.err (!%p802_p0)
}
  0x20   :  { %65 = dma.hbm_to_vmem [thread:$0]  %s1004_s7, 1024, %s60_s16, [#allocation5], %s812_s26, %s812_s26, %s813_s27  }
  0x21   :  { %806 = dma.done.wait [#allocation3], 1024  }
  0x22   :  { %807 = vsyncadd [#allocation3], 4294966272 }
  0x23   :  { %808 = dma.done.wait [#allocation5], 2048  }
  0x24   :  { %809 = vsyncadd [#allocation5], 4294965248  ;;  %v815_v0 = vmov 0.0   ;;  %vm816_vm0 = vmmov 0   ;;  %v714_v1 = vld [vmem:[%s998_s1 + $0x38] sm:$0xff]   ;;  %v716_v3 = vld [vmem:[%s998_s1 + $0x30] sm:$0xff]  }
  0x25   :  { %627 = vmatprep.subr.bf16.mxu0 %v815_v0  ;;  %647 = vmatprep.subr.bf16.mxu1 %v815_v0  ;;  %v715_v2 = vld [vmem:[#allocation2 + $0x38] sm:$0xff]   ;;  %v717_v4 = vld [vmem:[#allocation2 + $0x30] sm:$0xff]   ;;  %v718_v5 = vld [vmem:[%s998_s1 + $0x28] sm:$0xff]  }
  0x26   :  { %643 = vmatprep.mubr.msk.bf16.mxu0 %vm816_vm0, %v815_v0  ;;  %663 = vmatprep.mubr.msk.bf16.mxu1 %vm816_vm0, %v815_v0  ;;  %v719_v6 = vld [vmem:[#allocation2 + $0x28] sm:$0xff]   ;;  %v720_v7 = vld [vmem:[%s998_s1 + $0x20] sm:$0xff]   ;;  %v722_v9 = vld [vmem:[%s998_s1 + $0x18] sm:$0xff]  }
  0x27   :  { %628 = vmatpush3.bf16.msra.mxu0 %v714_v1  ;;  %648 = vmatpush3.bf16.msra.mxu1 %v715_v2  ;;  %v721_v8 = vld [vmem:[#allocation2 + $0x20] sm:$0xff]   ;;  %v723_v10 = vld [vmem:[#allocation2 + $0x18] sm:$0xff]   ;;  %v724_v11 = vld [vmem:[%s998_s1 + $0x10] sm:$0xff]  }
  0x28   :  { %629 = vmatprep.subr.bf16.mxu0 %v815_v0  ;;  %649 = vmatprep.subr.bf16.mxu1 %v815_v0  ;;  %v725_v12 = vld [vmem:[#allocation2 + $0x10] sm:$0xff]   ;;  %v726_v13 = vld [vmem:[%s998_s1 + $0x8] sm:$0xff]   ;;  %v728_v15 = vld [vmem:[%s998_s1] sm:$0xff]  }
  0x29   :  { %v727_v14 = vld [vmem:[#allocation2 + $0x8] sm:$0xff]   ;;  %v78_v16 = vld [vmem:[%s997_s0] sm:$0xff]  ;;  %v730_v20 = vld [vmem:[#allocation4 + $0x38] sm:$0xff]  }
  0x2a   :  { %v79_v17 = vld [vmem:[%s997_s0 + $0x8] sm:$0xff]  ;;  %v729_v18 = vld [vmem:[#allocation2] sm:$0xff]   ;;  %v731_v21 = vld [vmem:[#allocation6 + $0x38] sm:$0xff]  }
  0x2b   :  { %630 = vmatpush3.bf16.msra.mxu0 %v716_v3  ;;  %650 = vmatpush3.bf16.msra.mxu1 %v717_v4  ;;  %v80_v19 = vpack.c.bf16 %v79_v17, %v78_v16  ;;  %v732_v22 = vld [vmem:[#allocation4 + $0x30] sm:$0xff]   ;;  %v734_v24 = vld [vmem:[#allocation4 + $0x28] sm:$0xff]   ;;  %v736_v26 = vld [vmem:[#allocation4 + $0x20] sm:$0xff]  }
  0x2c   :  { %631 = vmatprep.subr.bf16.mxu0 %v815_v0  ;;  %651 = vmatprep.subr.bf16.mxu1 %v815_v0  ;;  %v733_v23 = vld [vmem:[#allocation6 + $0x30] sm:$0xff]   ;;  %v735_v25 = vld [vmem:[#allocation6 + $0x28] sm:$0xff]   ;;  %v737_v27 = vld [vmem:[#allocation6 + $0x20] sm:$0xff]  }
  0x2d   :  { %v738_v28 = vld [vmem:[#allocation4 + $0x18] sm:$0xff]   ;;  %v740_v30 = vld [vmem:[#allocation4 + $0x10] sm:$0xff]   ;;  %v742_v32 = vld [vmem:[#allocation4 + $0x8] sm:$0xff]  }
  0x2e   :  { %v739_v29 = vld [vmem:[#allocation6 + $0x18] sm:$0xff]   ;;  %v741_v31 = vld [vmem:[#allocation6 + $0x10] sm:$0xff]   ;;  %v743_v33 = vld [vmem:[#allocation6 + $0x8] sm:$0xff]  }
  0x2f   :  { %632 = vmatpush3.bf16.msra.mxu0 %v718_v5  ;;  %652 = vmatpush3.bf16.msra.mxu1 %v719_v6  ;;  %v744_v34 = vld [vmem:[#allocation4] sm:$0xff]  }
  0x30   :  { %633 = vmatprep.subr.bf16.mxu0 %v815_v0  ;;  %653 = vmatprep.subr.bf16.mxu1 %v815_v0  ;;  %v745_v35 = vld [vmem:[#allocation6] sm:$0xff]  }
  0x31   :  { %v555_v36 = vld [vmem:[%s999_s2] ss:$0 sm:$0xff] }
  0x32   :  { %v564_v37 = vld [vmem:[%s1001_s4] ss:$0 sm:$0xff] }
  0x33   :  { %634 = vmatpush3.bf16.msra.mxu0 %v720_v7  ;;  %654 = vmatpush3.bf16.msra.mxu1 %v721_v8  ;;  %v573_v50 = vld [vmem:[%s1003_s6] ss:$0 sm:$0xff] }
  0x34   :  { %635 = vmatprep.subr.bf16.mxu0 %v815_v0  ;;  %655 = vmatprep.subr.bf16.mxu1 %v815_v0  ;;  %v582_v51 = vld [vmem:[%s1005_s8] ss:$0 sm:$0xff] }
  0x37   :  { %636 = vmatpush3.bf16.msra.mxu0 %v722_v9  ;;  %656 = vmatpush3.bf16.msra.mxu1 %v723_v10 }
  0x38   :  { %637 = vmatprep.subr.bf16.mxu0 %v815_v0  ;;  %657 = vmatprep.subr.bf16.mxu1 %v815_v0 }
  0x3b   :  { %638 = vmatpush3.bf16.msra.mxu0 %v724_v11  ;;  %658 = vmatpush3.bf16.msra.mxu1 %v725_v12 }
  0x3c   :  { %639 = vmatprep.subr.bf16.mxu0 %v815_v0  ;;  %659 = vmatprep.subr.bf16.mxu1 %v815_v0 }
  0x3f   :  { %640 = vmatpush3.bf16.msra.mxu0 %v726_v13  ;;  %660 = vmatpush3.bf16.msra.mxu1 %v727_v14 }
  0x40   :  { %641 = vmatprep.subr.bf16.mxu0 %v815_v0  ;;  %661 = vmatprep.subr.bf16.mxu1 %v815_v0 }
  0x43   :  { %642 = vmatpush3.bf16.msra.mxu0 %v728_v15  ;;  %662 = vmatpush3.bf16.msra.mxu1 %v729_v18 }
  0x44   :  { %667 = vmatprep.subr.bf16.mxu0 %v815_v0  ;;  %687 = vmatprep.subr.bf16.mxu1 %v815_v0 }
  0x46   :  { %644 = vmatmul.mubr.bf16.vlgmr.msra.gmra.mxu0 %v80_v19  ;;  %664 = vmatmul.mubr.bf16.vlgmr.msra.gmra.mxu1 %v80_v19 }
  0x47   :  { %668 = vmatpush3.bf16.msra.mxu0 %v730_v20  ;;  %688 = vmatpush3.bf16.msra.mxu1 %v731_v21 }
  0x48   :  { %669 = vmatprep.subr.bf16.mxu0 %v815_v0  ;;  %689 = vmatprep.subr.bf16.mxu1 %v815_v0 }
  0x49   :  { %683 = vmatprep.mubr.msk.bf16.mxu0 %vm816_vm0, %v815_v0  ;;  %703 = vmatprep.mubr.msk.bf16.mxu1 %vm816_vm0, %v815_v0 }
  0x4b   :  { %670 = vmatpush3.bf16.msra.mxu0 %v732_v22  ;;  %690 = vmatpush3.bf16.msra.mxu1 %v733_v23 }
  0x4c   :  { %671 = vmatprep.subr.bf16.mxu0 %v815_v0  ;;  %691 = vmatprep.subr.bf16.mxu1 %v815_v0 }
  0x4f   :  { %672 = vmatpush3.bf16.msra.mxu0 %v734_v24  ;;  %692 = vmatpush3.bf16.msra.mxu1 %v735_v25 }
  0x50   :  { %673 = vmatprep.subr.bf16.mxu0 %v815_v0  ;;  %693 = vmatprep.subr.bf16.mxu1 %v815_v0 }
  0x53   :  { %674 = vmatpush3.bf16.msra.mxu0 %v736_v26  ;;  %694 = vmatpush3.bf16.msra.mxu1 %v737_v27 }
  0x54   :  { %675 = vmatprep.subr.bf16.mxu0 %v815_v0  ;;  %695 = vmatprep.subr.bf16.mxu1 %v815_v0 }
  0x57   :  { %676 = vmatpush3.bf16.msra.mxu0 %v738_v28  ;;  %696 = vmatpush3.bf16.msra.mxu1 %v739_v29 }
  0x58   :  { %677 = vmatprep.subr.bf16.mxu0 %v815_v0  ;;  %697 = vmatprep.subr.bf16.mxu1 %v815_v0 }
  0x5b   :  { %678 = vmatpush3.bf16.msra.mxu0 %v740_v30  ;;  %698 = vmatpush3.bf16.msra.mxu1 %v741_v31 }
  0x5c   :  { %679 = vmatprep.subr.bf16.mxu0 %v815_v0  ;;  %699 = vmatprep.subr.bf16.mxu1 %v815_v0 }
  0x5f   :  { %680 = vmatpush3.bf16.msra.mxu0 %v742_v32  ;;  %700 = vmatpush3.bf16.msra.mxu1 %v743_v33 }
  0x60   :  { %681 = vmatprep.subr.bf16.mxu0 %v815_v0  ;;  %701 = vmatprep.subr.bf16.mxu1 %v815_v0 }
  0x63   :  { %682 = vmatpush3.bf16.msra.mxu0 %v744_v34  ;;  %702 = vmatpush3.bf16.msra.mxu1 %v745_v35 }
  0x66   :  { %684 = vmatmul.mubr.bf16.vlgmr.msra.gmra.mxu0 %v80_v19  ;;  %704 = vmatmul.mubr.bf16.vlgmr.msra.gmra.mxu1 %v80_v19 }
 0x106   :  { %v186_v38 = vpop.f32.mrf.mxu0  ;;  %v300_v40 = vpop.f32.mrf.mxu1 }
 0x107   :  { %v187_v39 = vadd.f32 %v555_v36, %v186_v38  ;;  %v301_v41 = vadd.f32 %v564_v37, %v300_v40 }
 0x108   :  { %v645_v42 = vpop.f32.mrf.mxu0  ;;  %v665_v43 = vpop.f32.mrf.mxu1 }
 0x109   :  { %193 = vst [vmem:[%s1006_s9] sm:$0xff] %v187_v39  ;;  %307 = vst [vmem:[%s1007_s10] sm:$0xff] %v301_v41 }
 0x10a   :  { %v189_v44 = vpop.f32.mrf.mxu0  ;;  %v303_v46 = vpop.f32.mrf.mxu1 }
 0x10b   :  { %v190_v45 = vadd.f32 %v555_v36, %v189_v44  ;;  %v304_v47 = vadd.f32 %v564_v37, %v303_v46 }
 0x10c   :  { %v646_v48 = vpop.f32.mrf.mxu0  ;;  %v666_v49 = vpop.f32.mrf.mxu1 }
 0x10d   :  { %194 = vst [vmem:[%s1006_s9 + $0x8] sm:$0xff] %v190_v45  ;;  %308 = vst [vmem:[%s1007_s10 + $0x8] sm:$0xff] %v304_v47 }
 0x126   :  { %v414_v52 = vpop.f32.mrf.mxu0  ;;  %v528_v54 = vpop.f32.mrf.mxu1 }
 0x127   :  { %v415_v53 = vadd.f32 %v573_v50, %v414_v52  ;;  %v529_v55 = vadd.f32 %v582_v51, %v528_v54 }
 0x128   :  { %v685_v56 = vpop.f32.mrf.mxu0  ;;  %v705_v57 = vpop.f32.mrf.mxu1 }
 0x129   :  { %421 = vst [vmem:[%s1008_s11] sm:$0xff] %v415_v53  ;;  %535 = vst [vmem:[%s1009_s12] sm:$0xff] %v529_v55 }
 0x12a   :  { %v417_v58 = vpop.f32.mrf.mxu0  ;;  %v531_v60 = vpop.f32.mrf.mxu1 }
 0x12b   :  { %v418_v59 = vadd.f32 %v573_v50, %v417_v58  ;;  %v532_v61 = vadd.f32 %v582_v51, %v531_v60 }
 0x12c   :  { %v686_v62 = vpop.f32.mrf.mxu0  ;;  %v706_v63 = vpop.f32.mrf.mxu1 }
 0x12d   :  { %422 = vst [vmem:[%s1008_s11 + $0x8] sm:$0xff] %v418_v59  ;;  %536 = vst [vmem:[%s1009_s12 + $0x8] sm:$0xff] %v532_v61 }
 0x12e   :  { %553 = vsyncpa [#allocation3], 1 }
 0x12f   :  { %554 = vsyncpa [#allocation5], 1 }

// kernel: encoder_forward.13
= control target key start
LH: loop header
LB: loop body
LE: loop exit
PB: predicated region body
PF: predicated region fallthrough
CT: control target
= control target key end

     0   :  { %v223_v1 = vmov 0.0   ;;  %vm224_vm0 = vmmov 0   ;;  %s284_s0 = inlined_call_operand.vmem [shape: f32[16,128], index: 0, kind: input, shape index: {}]   ;;  %s285_s1 = inlined_call_operand.vmem [shape: bf16[128,16], index: 1, kind: input, shape index: {}]   ;;  %s286_s2 = inlined_call_operand.vmem [shape: f32[1,16], index: 2, kind: input, shape index: {}]   ;;  %s287_s3 = inlined_call_operand.hbm [shape: f32[16,16], index: 3, kind: output, shape index: {}]  }
   0x1   :  { %v193_v0 = vld [vmem:[%s285_s1 + $0x38] sm:$0xff]   ;;  %168 = vmatprep.subr.bf16.mxu0 %v223_v1  ;;  %v194_v2 = vld [vmem:[%s285_s1 + $0x30] sm:$0xff]   ;;  %184 = vmatprep.mubr.msk.bf16.mxu0 %vm224_vm0, %v223_v1  ;;  %v195_v3 = vld [vmem:[%s285_s1 + $0x28] sm:$0xff]  }
   0x2   :  { %169 = vmatpush3.bf16.msra.mxu0 %v193_v0 }
   0x3   :  { %170 = vmatprep.subr.bf16.mxu0 %v223_v1 }
   0x6   :  { %171 = vmatpush3.bf16.msra.mxu0 %v194_v2 }
   0x7   :  { %172 = vmatprep.subr.bf16.mxu0 %v223_v1 }
   0x8   :  { %8 = vsyncpa [#allocation3], 0  ;;  %v196_v4 = vld [vmem:[%s285_s1 + $0x20] sm:$0xff]   ;;  %v197_v5 = vld [vmem:[%s285_s1 + $0x18] sm:$0xff]   ;;  %vm131_vm1 = vcmask 130048  }
   0x9   :  { %v198_v6 = vld [vmem:[%s285_s1 + $0x10] sm:$0xff]   ;;  %v199_v7 = vld [vmem:[%s285_s1 + $0x8] sm:$0xff]   ;;  %v200_v8 = vld [vmem:[%s285_s1] sm:$0xff]   ;;  %s225_s1 = smov [#allocation2]  }
   0xa   :  { %173 = vmatpush3.bf16.msra.mxu0 %v195_v3  ;;  %v16_v9 = vld [vmem:[%s284_s0] sm:$0xff]  ;;  %v17_v10 = vld [vmem:[%s284_s0 + $0x8] sm:$0xff]  ;;  %s139_s7 = sshll.u32 %s225_s1, 4  ;;  %s140_s7 = int_to_ptr.vmem [resolvable:$true] %s139_s7 }
   0xb   :  { %174 = vmatprep.subr.bf16.mxu0 %v223_v1  ;;  %v18_v11 = vpack.c.bf16 %v17_v10, %v16_v9  ;;  %v150_v12 = vld [vmem:[%s286_s2] ss:$0 sm:$0xff]  ;;  %s201_s0 = scalar_lea.vmem %s140_s7, 256  ;;  %p206_p1 = scmp.lt.s32.totalorder %s140_s7, %s140_s7 }
   0xc   :  { %p202_p0 = scmp.ne.s32.totalorder %s140_s7, %s201_s0  ;;  %p207_p2 = scmp.lt.s32.totalorder %s201_s0, %s201_s0 }
   0xe   :  { %175 = vmatpush3.bf16.msra.mxu0 %v196_v4  ;;  %p208_p3 = por %p207_p2, %p206_p1 }
   0xf   :  { %176 = vmatprep.subr.bf16.mxu0 %v223_v1 }
  0x10   :  { %p209_p4 = pnand %p208_p3, %p202_p0 }
  0x12   :  { %177 = vmatpush3.bf16.msra.mxu0 %v197_v5 }
  0x13   :  { %178 = vmatprep.subr.bf16.mxu0 %v223_v1 }
  0x16   :  { %179 = vmatpush3.bf16.msra.mxu0 %v198_v6 }
  0x17   :  { %180 = vmatprep.subr.bf16.mxu0 %v223_v1 }
  0x1a   :  { %181 = vmatpush3.bf16.msra.mxu0 %v199_v7 }
  0x1b   :  { %182 = vmatprep.subr.bf16.mxu0 %v223_v1 }
  0x1e   :  { %183 = vmatpush3.bf16.msra.mxu0 %v200_v8 }
  0x21   :  { %185 = vmatmul.mubr.bf16.vlgmr.msra.gmra.mxu0 %v18_v11 }
  0xe1   :  { %v124_v13 = vpop.f32.mrf.mxu0 }
  0xe2   :  { %v125_v14 = vadd.f32 %v150_v12, %v124_v13 }
  0xe3   :  { %v186_v15 = vpop.f32.mrf.mxu0 }
  0xe4   :  { %132 = vst.msk [vmem:[#allocation2] sm:$0xff] %vm131_vm1, %v125_v14 }
  0xe5   :  { %v127_v16 = vpop.f32.mrf.mxu0 }
  0xe6   :  { %v128_v17 = vadd.f32 %v150_v12, %v127_v16 }
  0xe7   :  { %v187_v18 = vpop.f32.mrf.mxu0 }
  0xe8   :  { %133 = vst.msk [vmem:[#allocation2 + $0x8] sm:$0xff] %vm131_vm1, %v128_v17 }
  0xe9   :  { %212 = shalt.err (!%p209_p4)
}
  0xea   :  { %s226_s2 = smov 128   ;;  %s227_s8 = smov 8  }
  0xeb   :  { %145 = dma.vmem_to_hbm [thread:$0]  %s140_s7, 256, %s287_s3, [#allocation3], %s226_s2, %s226_s2, %s227_s8  }
  0xec   :  { %221 = dma.done.wait [#allocation3], 256  }
  0xed   :  { %222 = vsyncadd [#allocation3], 4294967040 }
  0xee   :  { %149 = vsyncpa [#allocation3], 1 }

// kernel: encoder_forward.10
= control target key start
LH: loop header
LB: loop body
LE: loop exit
PB: predicated region body
PF: predicated region fallthrough
CT: control target
= control target key end

     0   :  { %s1799_s29 = smov 0   ;;  %s2182_s0 = inlined_call_operand.vmem [shape: f32[16,128], index: 0, kind: input, shape index: {}, may-alias: {0,13}]   ;;  %s2183_s1 = inlined_call_operand.vmem [shape: f32[16,16,128], index: 1, kind: input, shape index: {}, may-alias: {1,14}]   ;;  %s2184_s2 = inlined_call_operand.vmem [shape: f32[16,16], index: 2, kind: input, shape index: {}]   ;;  %s2185_s3 = inlined_call_operand.vmem [shape: f32[16,128], index: 3, kind: input, shape index: {}]   ;;  %s2186_s4 = inlined_call_operand.vmem [shape: f32[16,128], index: 4, kind: input, shape index: {}]   ;;  %s2187_s5 = inlined_call_operand.vmem [shape: f32[16,128], index: 5, kind: input, shape index: {}]   ;;  %s2188_s6 = inlined_call_operand.vmem [shape: f32[16,128], index: 6, kind: input, shape index: {}]   ;;  %s2189_s7 = inlined_call_operand.vmem [shape: bf16[128,128], index: 7, kind: input, shape index: {}]   ;;  %s2190_s8 = inlined_call_operand.vmem [shape: f32[1,128], index: 8, kind: input, shape index: {}]   ;;  %s2191_s9 = inlined_call_operand.vmem [shape: f32[1,128], index: 9, kind: input, shape index: {}]   ;;  %s2192_s10 = inlined_call_operand.vmem [shape: f32[1,128], index: 10, kind: input, shape index: {}]   ;;  %s2193_s11 = inlined_call_operand.vmem [shape: f32[1,128], index: 11, kind: input, shape index: {}]   ;;  %s2194_s12 = inlined_call_operand.vmem [shape: f32[1,128], index: 12, kind: input, shape index: {}]   ;;  %s2195_s13 = inlined_call_operand.vmem [shape: f32[16,128], index: 13, kind: output, shape index: {0}, may-alias: {0,13}]   ;;  %s2196_s14 = inlined_call_operand.vmem [shape: f32[16,16,128], index: 14, kind: output, shape index: {1}, may-alias: {1,14}]  }
   0x1 LB: > { %s1504_s30 = sadd.s32 4294967295, %s1721_s29   ;;  %p1508_p0 = scmp.ge.s32.totalorder %s1721_s29, 1  ;;  %s1721_s29 = sphi %s1799_s29, %s25_s29  }
   0x2   : > { %p453_p1 = scmp.lt.s32.totalorder %s1721_s29, 3 }
   0x4   : > { %p454_p2 = pnand %p1508_p0, %p453_p1 }
   0x5   : > { %s1510_s17 = sshll.u32 (!%p454_p2), %s1504_s30, 3  ;;  %p521_p4 = scmp.lt.s32.totalorder (!%p454_p2), %s1504_s30, 1 }
   0x6   : > { %457 = sbr.rel (%p454_p2) target bundleno = 359 (0x167), region = 72  ;;  %p526_p3 = scmp.lt.s32.totalorder (!%p454_p2), %s1510_s17, 15 }
   0xb   : > { %v1626_v0 = vld [vmem:[%s2189_s7 + $0x38] sm:$0xff]   ;;  %v1627_v1 = vld [vmem:[%s2189_s7 + $0x30] sm:$0xff]   ;;  %v772_v2 = vlaneseq  ;;  %s2198_s17 = smov (!%p526_p3, %s1510_s17), 15  ;;  %v1628_v3 = vld [vmem:[%s2189_s7 + $0x28] sm:$0xff]   ;;  %s2200_s30 = smov (!%p521_p4, %s1504_s30), 1  ;;  %vm1237_vm0 = vcmask 1041409  }
   0xc   : > { %1569 = vmatprep.subr.bf16.mxu0 %v1626_v0  ;;  %1601 = vmatprep.subr.bf16.mxu1 %v1626_v0  ;;  %s1551_s22 = sshll.u32 %s2198_s17, 4  ;;  %v1629_v5 = vld [vmem:[%s2189_s7 + $0x20] sm:$0xff]   ;;  %s1831_s28 = sshll.u32 %s2200_s30, 3  ;;  %v1630_v14 = vld [vmem:[%s2189_s7 + $0x18] sm:$0xff]   ;;  %v1631_v18 = vld [vmem:[%s2189_s7 + $0x10] sm:$0xff]   ;;  %vm1239_vm1 = vcmask 1042434  }
   0xd   : > { %1570 = vmatpush3.bf16.msra.mxu0 %v1626_v0  ;;  %1609 = vmatpush3.bf16.msra.mxu1 %v1626_v0  ;;  %s1824_s25 = scalar_lea.vmem %s2183_s1, %s1551_s22  ;;  %v1826_v4 = vshrl.u32 %v772_v2, 7  ;;  %s535_s16 = scalar_lea.vmem %s2184_s2, %s1831_s28  ;;  %v1632_v20 = vld [vmem:[%s2189_s7 + $0x8] sm:$0xff]   ;;  %v1633_v23 = vld [vmem:[%s2189_s7] sm:$0xff]   ;;  %v1723_v51 = vmov 1966171168   ;;  %vm1241_vm2 = vcmask 1043459  }
   0xe   : > { %1571 = vmatprep.subr.bf16.mxu0 %v1627_v1  ;;  %1602 = vmatprep.subr.bf16.mxu1 %v1627_v1  ;;  %v1834_v6 = vld [vmem:[%s1824_s25] sm:$0xff]  ;;  %v1837_v7 = vld [vmem:[%s1824_s25 + $0x8] sm:$0xff]  ;;  %v1880_v26 = vld [vmem:[%s1824_s25 + $0x10] sm:$0xff]  ;;  %v770_v52 = vunpack.c.l.s4 %v1723_v51  ;;  %s543_s30 = scalar_lea.vmem %s2186_s4, %s1831_s28  ;;  %vm1243_vm3 = vcmask 1044484   ;;  %vm1245_vm4 = vcmask 1045509   ;;  %s539_s23 = scalar_lea.vmem %s2185_s3, %s1831_s28  ;;  %vm1247_vm5 = vcmask 1046534  }
   0xf   : > { %v1840_v8 = vld [vmem:[%s1824_s25 + $0x40] sm:$0xff]  ;;  %v572_v9 = vpack.c.bf16 %v1837_v7, %v1834_v6  ;;  %v1845_v10 = vld [vmem:[%s1824_s25 + $0x48] sm:$0xff]  ;;  %v983_v12 = vsub.s32 1, %v1826_v4  ;;  %v1855_v13 = vsub.s32 0, %v1826_v4  ;;  %v994_v19 = vsub.s32 2, %v1826_v4  ;;  %v1883_v27 = vld [vmem:[%s1824_s25 + $0x18] sm:$0xff]  ;;  %s547_s18 = scalar_lea.vmem %s2195_s13, %s1831_s28 }
  0x10   : > { %v576_v11 = vpack.c.bf16 %v1845_v10, %v1840_v8  ;;  %v1860_v15 = vld [vmem:[%s535_s16] sm:$0xff]  ;;  %v1005_v22 = vsub.s32 3, %v1826_v4  ;;  %v1016_v25 = vsub.s32 4, %v1826_v4  ;;  %v1886_v28 = vld [vmem:[%s1824_s25 + $0x50] sm:$0xff]  ;;  %v1889_v29 = vld [vmem:[%s1824_s25 + $0x58] sm:$0xff]  ;;  %v1027_v35 = vsub.s32 5, %v1826_v4  ;;  %s2009_s16 = scalar_lea.vmem %s2196_s14, %s1551_s22 }
  0x11   : > { %1572 = vmatpush3.bf16.msra.mxu0 %v1627_v1  ;;  %1610 = vmatpush3.bf16.msra.mxu1 %v1627_v1  ;;  %v984_v16 = vrot.slane %v1860_v15, %v983_v12  ;;  %v973_v17 = vrot.slane %v1860_v15, %v1855_v13  ;;  %v995_v21 = vrot.slane %v1860_v15, %v994_v19  ;;  %v1892_v30 = vld [vmem:[%s1824_s25 + $0x20] sm:$0xff]  ;;  %v1895_v31 = vld [vmem:[%s1824_s25 + $0x28] sm:$0xff]  ;;  %v1038_v41 = vsub.s32 6, %v1826_v4  ;;  %v1916_v42 = vld [vmem:[%s1824_s25 + $0x30] sm:$0xff] }
  0x12   : > { %1573 = vmatprep.subr.bf16.mxu0 %v1628_v3  ;;  %1603 = vmatprep.subr.bf16.mxu1 %v1628_v3  ;;  %v1006_v24 = vrot.slane %v1860_v15, %v1005_v22  ;;  %v1898_v32 = vld [vmem:[%s1824_s25 + $0x60] sm:$0xff]  ;;  %v1901_v33 = vld [vmem:[%s1824_s25 + $0x68] sm:$0xff]  ;;  %v1017_v34 = vrot.slane %v1860_v15, %v1016_v25  ;;  %v573_v36 = vpack.c.bf16 %v1883_v27, %v1880_v26  ;;  %v1919_v43 = vld [vmem:[%s1824_s25 + $0x38] sm:$0xff]  ;;  %v1049_v47 = vsub.s32 7, %v1826_v4 }
  0x13   : > { %1585 = vmatprep.mubr.bf16.mxu0 %v572_v9  ;;  %1593 = vmatprep.mubr.bf16.mxu1 %v576_v11  ;;  %v577_v37 = vpack.c.bf16 %v1889_v29, %v1886_v28  ;;  %v574_v38 = vpack.c.bf16 %v1895_v31, %v1892_v30  ;;  %v578_v39 = vpack.c.bf16 %v1901_v33, %v1898_v32  ;;  %v1922_v44 = vld [vmem:[%s1824_s25 + $0x70] sm:$0xff]  ;;  %v1925_v45 = vld [vmem:[%s1824_s25 + $0x78] sm:$0xff]  ;;  %v771_v53 = vunpack.c.0.s8 %v770_v52  ;;  %v766_v54 = vld [vmem:[%s543_s30] sm:$0xff] }
  0x14   : > { %986 = vbcast.lane.b32.xlu1 %v984_v16, 256  ;;  %975 = vbcast.lane.b32.xlu0 %v973_v17, 256  ;;  %v1028_v40 = vrot.slane %v1860_v15, %v1027_v35  ;;  %v1039_v46 = vrot.slane %v1860_v15, %v1038_v41  ;;  %v575_v48 = vpack.c.bf16 %v1919_v43, %v1916_v42  ;;  %v1942_v63 = vld [vmem:[%s2190_s8] ss:$0 sm:$0xff]  ;;  %vm1249_vm6 = vcmask 1047559  }
  0x15   : > { %1574 = vmatpush3.bf16.msra.mxu0 %v1628_v3  ;;  %1611 = vmatpush3.bf16.msra.mxu1 %v1628_v3  ;;  %v579_v49 = vpack.c.bf16 %v1925_v45, %v1922_v44  ;;  %v1050_v50 = vrot.slane %v1860_v15, %v1049_v47  ;;  %v774_v55 = vsub.s32 %v771_v53, %v1826_v4  ;;  %v1947_v2 = vld [vmem:[%s2188_s6] sm:$0xff] }
  0x16   : > { %1575 = vmatprep.subr.bf16.mxu0 %v1629_v5  ;;  %1604 = vmatprep.subr.bf16.mxu1 %v1629_v5  ;;  %v768_v56 = vcombine.high %v766_v54, %v766_v54  ;;  %v1985_v47 = vld [vmem:[%s2194_s12] ss:$0 sm:$0xff] }
  0x17   : > { %v775_v57 = vrot.slane %v766_v54, %v774_v55 }
  0x18   : > { %990 = vbcast.lane.b32.xlu1 %v984_v16, 264  ;;  %979 = vbcast.lane.b32.xlu0 %v973_v17, 264  ;;  %v782_v58 = vrot.slane %v768_v56, %v774_v55 }
  0x19   : > { %1576 = vmatpush3.bf16.msra.mxu0 %v1629_v5  ;;  %1612 = vmatpush3.bf16.msra.mxu1 %v1629_v5  ;;  %v783_v59 = vcombine.high %v775_v57, %v775_v57  ;;  %v791_v0 = vrot.slane %v775_v57, %v774_v55 }
  0x1a   : > { %1577 = vmatprep.subr.bf16.mxu0 %v1630_v14  ;;  %1605 = vmatprep.subr.bf16.mxu1 %v1630_v14  ;;  %v784_v60 = vcombine.high %v782_v58, %v782_v58  ;;  %v1949_v4 = vrot.slane %v782_v58, %v774_v55 }
  0x1b   : > { %v805_v61 = vrot.slane %v783_v59, %v774_v55  ;;  %v813_v9 = vcombine.high %v791_v0, %v791_v0 }
  0x1c   : > { %1001 = vbcast.lane.b32.xlu1 %v995_v21, 264  ;;  %997 = vbcast.lane.b32.xlu0 %v995_v21, 256  ;;  %v812_v62 = vrot.slane %v784_v60, %v774_v55  ;;  %v1967_v25 = vrot.slane %v1949_v4, %v1855_v13  ;;  %v814_v52 = vcombine.high %v1949_v4, %v1949_v4 }
  0x1d   : > { %1578 = vmatpush3.bf16.msra.mxu0 %v1630_v14  ;;  %1613 = vmatpush3.bf16.msra.mxu1 %v1630_v14  ;;  %v815_v5 = vcombine.high %v805_v61, %v805_v61  ;;  %v824_v12 = vrot.slane %v805_v61, %v1855_v13 }
  0x1e   : > { %1579 = vmatprep.subr.bf16.mxu0 %v1631_v18  ;;  %1606 = vmatprep.subr.bf16.mxu1 %v1631_v18  ;;  %v840_v15 = vrot.slane %v812_v62, %v1855_v13 }
  0x20   : > { %1012 = vbcast.lane.b32.xlu1 %v1006_v24, 264  ;;  %1008 = vbcast.lane.b32.xlu0 %v1006_v24, 256  ;;  %v820_v24 = vrot.slane %v791_v0, %v1855_v13 }
  0x21   : > { %1580 = vmatpush3.bf16.msra.mxu0 %v1631_v18  ;;  %1614 = vmatpush3.bf16.msra.mxu1 %v1631_v18  ;;  %v816_v18 = vcombine.high %v812_v62, %v812_v62 }
  0x22   : > { %1581 = vmatprep.subr.bf16.mxu0 %v1632_v20  ;;  %1607 = vmatprep.subr.bf16.mxu1 %v1632_v20 }
  0x23   : > { %v1990_v51 = vrot.slane %v816_v18, %v1855_v13 }
  0x24   : > { %1023 = vbcast.lane.b32.xlu1 %v1017_v34, 264  ;;  %1019 = vbcast.lane.b32.xlu0 %v1017_v34, 256 }
  0x25   : > { %1582 = vmatpush3.bf16.msra.mxu0 %v1632_v20  ;;  %1615 = vmatpush3.bf16.msra.mxu1 %v1632_v20 }
  0x26   : > { %1583 = vmatprep.subr.bf16.mxu0 %v1633_v23  ;;  %1608 = vmatprep.subr.bf16.mxu1 %v1633_v23 }
  0x28   : > { %1034 = vbcast.lane.b32.xlu1 %v1028_v40, 264  ;;  %1030 = vbcast.lane.b32.xlu0 %v1028_v40, 256 }
  0x29   : > { %1584 = vmatpush3.bf16.msra.mxu0 %v1633_v23  ;;  %1616 = vmatpush3.bf16.msra.mxu1 %v1633_v23  ;;  %v1962_v23 = vld [vmem:[%s2193_s11] ss:$0 sm:$0xff] }
  0x2c   : > { %1586 = vmatmul.mubr.bf16.vlgmr.msra.gmra.mxu0 %v573_v36  ;;  %1594 = vmatmul.mubr.bf16.vlgmr.msra.gmra.mxu1 %v577_v37  ;;  %v1970_v36 = vrot.slane %v815_v5, %v1855_v13  ;;  %v1973_v37 = vrot.slane %v813_v9, %v1855_v13 }
  0x2d   : > { %1589 = vmatprep.mubr.bf16.mxu0 %v574_v38  ;;  %1597 = vmatprep.mubr.bf16.mxu1 %v578_v39 }
  0x2e   : > { %1045 = vbcast.lane.b32.xlu1 %v1039_v46, 264  ;;  %1041 = vbcast.lane.b32.xlu0 %v1039_v46, 256  ;;  %v1980_v46 = vld [vmem:[%s2188_s6 + $0x8] sm:$0xff] }
  0x32   : > { %1056 = vbcast.lane.b32.xlu1 %v1050_v50, 264  ;;  %1052 = vbcast.lane.b32.xlu0 %v1050_v50, 256 }
  0x34   : > { %1590 = vmatmul.mubr.bf16.gmra.mxu0 %v575_v48  ;;  %1598 = vmatmul.mubr.bf16.gmra.mxu1 %v579_v49 }
  0xec   : > { %v1587_v1 = vpop.f32.mrf.mxu0  ;;  %v1595_v3 = vpop.f32.mrf.mxu1 }
  0xed   : > { %v694_v11 = vadd.f32 %v1587_v1, %v1942_v63  ;;  %v726_v14 = vadd.f32 %v1595_v3, %v1942_v63 }
  0xee   : > { %v685_v16 = vpop.f32.mrf.mxu0  ;;  %v717_v17 = vpop.f32.mrf.mxu1 }
  0xef   : > { %v752_v19 = vadd.f32 %v1947_v2, %v694_v11  ;;  %v760_v20 = vadd.f32 %v1947_v2, %v726_v14  ;;  %v686_v21 = vadd.f32 %v1942_v63, %v685_v16  ;;  %v718_v22 = vadd.f32 %v1942_v63, %v717_v17 }
  0xf0   : > { %v1588_v34 = vpop.f32.mrf.mxu0  ;;  %v1596_v35 = vpop.f32.mrf.mxu1 }
  0xf1   : > { %v859_v38 = vadd.f32 %v824_v12, %v752_v19  ;;  %v867_v39 = vadd.f32 %v840_v15, %v760_v20  ;;  %v750_v40 = vadd.f32 %v1947_v2, %v686_v21  ;;  %v758_v41 = vadd.f32 %v1947_v2, %v718_v22 }
  0xf2   : > { %v697_v48 = vadd.f32 %v1588_v34, %v1942_v63  ;;  %v729_v49 = vadd.f32 %v1596_v35, %v1942_v63  ;;  %v688_v50 = vpop.f32.mrf.mxu0  ;;  %v720_v20 = vpop.f32.mrf.mxu1 }
  0xf3   : > { %v1531_v53 = vmul.f32 -1.442695, %v859_v38  ;;  %v1279_v54 = vmul.f32 %v1962_v23, %v859_v38  ;;  %v1539_v55 = vmul.f32 -1.442695, %v867_v39  ;;  %v1287_v56 = vmul.f32 %v1962_v23, %v867_v39 }
  0xf4   : > { %v857_v57 = vadd.f32 %v820_v24, %v750_v40  ;;  %v865_v58 = vadd.f32 %v1967_v25, %v758_v41  ;;  %v753_v59 = vadd.f32 %v1980_v46, %v697_v48  ;;  %v761_v60 = vadd.f32 %v1980_v46, %v729_v49  ;;  %v1591_v21 = vpop.f32.mrf.mxu0 }
  0xf5   : > { %1635 = vpow2.f32 %v1531_v53  ;;  %v1302_v61 = vadd.f32 %v1985_v47, %v1279_v54  ;;  %v1310_v62 = vadd.f32 %v1985_v47, %v1287_v56  ;;  %v689_v0 = vadd.f32 %v1942_v63, %v688_v50  ;;  %v1599_v53 = vpop.f32.mrf.mxu1 }
  0xf6   : > { %1637 = vpow2.f32 %v1539_v55  ;;  %v1529_v1 = vmul.f32 -1.442695, %v857_v57  ;;  %v1277_v3 = vmul.f32 %v1962_v23, %v857_v57  ;;  %v1537_v5 = vmul.f32 -1.442695, %v865_v58  ;;  %v701_v54 = vpop.f32.mrf.mxu0 }
  0xf7   : > { %v1318_v9 = vmax.f32 %v1302_v61, 0.0  ;;  %v1326_v11 = vmax.f32 %v1310_v62, 0.0  ;;  %v1285_v14 = vmul.f32 %v1962_v23, %v865_v58  ;;  %v860_v16 = vadd.f32 %v824_v12, %v753_v59  ;;  %v2033_v62 = vpop.permute.xlu1 %986 }
  0xf8   : > { %1639 = vpow2.f32 %v1529_v1  ;;  %v1300_v17 = vadd.f32 %v1985_v47, %v1277_v3  ;;  %v868_v18 = vadd.f32 %v840_v15, %v761_v60  ;;  %v751_v19 = vadd.f32 %v1980_v46, %v689_v0 }
  0xf9   : > { %v1337_v22 = vadd.f32 %v1318_v9, %v1880_v26  ;;  %v1345_v12 = vadd.f32 %v1326_v11, %v1886_v28  ;;  %1641 = vpow2.f32 %v1537_v5  ;;  %v1308_v34 = vadd.f32 %v1985_v47, %v1285_v14  ;;  %v733_v9 = vpop.f32.mrf.mxu1  ;;  %v2039_v11 = vpop.permute.xlu0 %975 }
  0xfa   : > { %v1316_v35 = vmax.f32 %v1300_v17, 0.0  ;;  %v1532_v38 = vmul.f32 -1.442695, %v860_v16  ;;  %v1280_v39 = vmul.f32 %v1962_v23, %v860_v16  ;;  %v1540_v40 = vmul.f32 -1.442695, %v868_v18 }
  0xfb   : > { %1353 = vst [vmem:[%s2009_s16 + $0x10] sm:$0xff] %v1337_v22  ;;  %1361 = vst [vmem:[%s2009_s16 + $0x50] sm:$0xff] %v1345_v12  ;;  %v1324_v15 = vmax.f32 %v1308_v34, 0.0  ;;  %v1288_v41 = vmul.f32 %v1962_v23, %v868_v18  ;;  %v858_v48 = vadd.f32 %v820_v24, %v751_v19  ;;  %v721_v49 = vadd.f32 %v1942_v63, %v720_v20 }
  0xfc   : > { %v1335_v26 = vadd.f32 %v1316_v35, %v1834_v6  ;;  %1643 = vpow2.f32 %v1532_v38  ;;  %v1303_v28 = vadd.f32 %v1985_v47, %v1280_v39  ;;  %v710_v50 = vadd.f32 %v1591_v21, %v1942_v63 }
  0xfd   : > { %v1343_v55 = vadd.f32 %v1324_v15, %v1840_v8  ;;  %1645 = vpow2.f32 %v1540_v40  ;;  %v1311_v56 = vadd.f32 %v1985_v47, %v1288_v41  ;;  %v1530_v57 = vmul.f32 -1.442695, %v858_v48 }
  0xfe   : > { %1351 = vst [vmem:[%s2009_s16] sm:$0xff] %v1335_v26  ;;  %v1319_v24 = vmax.f32 %v1303_v28, 0.0  ;;  %v1278_v58 = vmul.f32 %v1962_v23, %v858_v48  ;;  %v759_v59 = vadd.f32 %v1980_v46, %v721_v49  ;;  %v756_v6 = vadd.f32 %v1947_v2, %v710_v50  ;;  %v2061_v26 = vpop.permute.xlu1 %990 }
  0xff   : > { %1359 = vst [vmem:[%s2009_s16 + $0x40] sm:$0xff] %v1343_v55  ;;  %v1327_v60 = vmax.f32 %v1311_v56, 0.0  ;;  %1647 = vpow2.f32 %v1530_v57  ;;  %v742_v61 = vadd.f32 %v1599_v53, %v1942_v63  ;;  %v702_v8 = vadd.f32 %v1942_v63, %v701_v54  ;;  %v1592_v54 = vpop.f32.mrf.mxu0  ;;  %v2064_v55 = vpop.permute.xlu0 %979 }
 0x100   : > { %v1338_v0 = vadd.f32 %v1319_v24, %v1883_v27  ;;  %v1301_v1 = vadd.f32 %v1985_v47, %v1278_v58  ;;  %v866_v3 = vadd.f32 %v1967_v25, %v759_v59  ;;  %v863_v5 = vadd.f32 %v1970_v36, %v756_v6 }
 0x101   : > { %v1346_v14 = vadd.f32 %v1327_v60, %v1889_v29  ;;  %v764_v16 = vadd.f32 %v1947_v2, %v742_v61  ;;  %v754_v17 = vadd.f32 %v1947_v2, %v702_v8  ;;  %v734_v18 = vadd.f32 %v1942_v63, %v733_v9  ;;  %v1600_v8 = vpop.f32.mrf.mxu1 }
 0x102   : > { %v1636_v19 = vpop.eup %1635  ;;  %1354 = vst [vmem:[%s2009_s16 + $0x18] sm:$0xff] %v1338_v0  ;;  %v1317_v27 = vmax.f32 %v1301_v1, 0.0  ;;  %v1538_v20 = vmul.f32 -1.442695, %v866_v3  ;;  %v1286_v25 = vmul.f32 %v1962_v23, %v866_v3  ;;  %v1535_v21 = vmul.f32 -1.442695, %v863_v5 }
 0x103   : > { %v1638_v22 = vpop.eup %1637  ;;  %v923_v12 = vadd.f32 1.0, %v1636_v19  ;;  %1362 = vst [vmem:[%s2009_s16 + $0x58] sm:$0xff] %v1346_v14  ;;  %v1283_v34 = vmul.f32 %v1962_v23, %v863_v5  ;;  %v871_v29 = vadd.f32 %v1990_v51, %v764_v16  ;;  %v861_v35 = vadd.f32 %v1973_v37, %v754_v17  ;;  %v2081_v19 = vpop.permute.xlu0 %997 }
 0x104   : > { %v931_v38 = vadd.f32 1.0, %v1638_v22  ;;  %v1336_v39 = vadd.f32 %v1317_v27, %v1837_v7  ;;  %1649 = vpow2.f32 %v1538_v20  ;;  %v1309_v40 = vadd.f32 %v1985_v47, %v1286_v25  ;;  %v736_v25 = vpop.f32.mrf.mxu1 }
 0x105   : > { %v1640_v15 = vpop.eup %1639  ;;  %1651 = vrcp.f32 %v923_v12  ;;  %v1306_v41 = vadd.f32 %v1985_v47, %v1283_v34  ;;  %v1291_v48 = vmul.f32 %v1962_v23, %v871_v29  ;;  %v2059_v49 = vrot.slane %v814_v52, %v1855_v13 }
 0x106   : > { %v1642_v28 = vpop.eup %1641  ;;  %1653 = vrcp.f32 %v931_v38  ;;  %v921_v7 = vadd.f32 1.0, %v1640_v15  ;;  %1352 = vst [vmem:[%s2009_s16 + $0x8] sm:$0xff] %v1336_v39  ;;  %v1325_v50 = vmax.f32 %v1309_v40, 0.0  ;;  %v1543_v53 = vmul.f32 -1.442695, %v871_v29 }
 0x107   : > { %v929_v56 = vadd.f32 1.0, %v1642_v28  ;;  %v1322_v57 = vmax.f32 %v1306_v41, 0.0  ;;  %v1314_v24 = vadd.f32 %v1985_v47, %v1291_v48  ;;  %v1533_v58 = vmul.f32 -1.442695, %v861_v35 }
 0x108   : > { %v1344_v13 = vadd.f32 %v1325_v50, %v1845_v10  ;;  %1655 = vpow2.f32 %v1535_v21  ;;  %v1281_v4 = vmul.f32 %v1962_v23, %v861_v35  ;;  %v762_v52 = vadd.f32 %v1947_v2, %v734_v18  ;;  %v2079_v18 = vpop.permute.xlu1 %1001 }
 0x109   : > { %v1644_v59 = vpop.eup %1643  ;;  %1657 = vrcp.f32 %v921_v7  ;;  %v1341_v6 = vadd.f32 %v1322_v57, %v1916_v42  ;;  %v1330_v60 = vmax.f32 %v1314_v24, 0.0  ;;  %v713_v61 = vadd.f32 %v1592_v54, %v1942_v63  ;;  %v704_v42 = vpop.f32.mrf.mxu0 }
 0x10a   : > { %v1646_v0 = vpop.eup %1645  ;;  %1659 = vrcp.f32 %v929_v56  ;;  %v924_v1 = vadd.f32 1.0, %v1644_v59  ;;  %1360 = vst [vmem:[%s2009_s16 + $0x48] sm:$0xff] %v1344_v13  ;;  %v1304_v10 = vadd.f32 %v1985_v47, %v1281_v4  ;;  %v869_v3 = vadd.f32 %v2059_v49, %v762_v52  ;;  %v2101_v56 = vpop.permute.xlu0 %1008 }
 0x10b   : > { %1357 = vst [vmem:[%s2009_s16 + $0x30] sm:$0xff] %v1341_v6  ;;  %1661 = vpow2.f32 %v1543_v53  ;;  %v1349_v2 = vadd.f32 %v1330_v60, %v1922_v44  ;;  %v757_v5 = vadd.f32 %v1980_v46, %v713_v61  ;;  %v932_v14 = vadd.f32 1.0, %v1646_v0 }
 0x10c   : > { %v1648_v9 = vpop.eup %1647  ;;  %1663 = vrcp.f32 %v924_v1  ;;  %v1320_v16 = vmax.f32 %v1304_v10, 0.0  ;;  %v1289_v17 = vmul.f32 %v1962_v23, %v869_v3  ;;  %v745_v44 = vadd.f32 %v1600_v8, %v1942_v63  ;;  %v2099_v54 = vpop.permute.xlu1 %1012 }
 0x10d   : > { %v922_v27 = vadd.f32 1.0, %v1648_v9  ;;  %1365 = vst [vmem:[%s2009_s16 + $0x70] sm:$0xff] %v1349_v2  ;;  %1665 = vpow2.f32 %v1533_v58  ;;  %v864_v20 = vadd.f32 %v1970_v36, %v757_v5  ;;  %v1541_v22 = vmul.f32 -1.442695, %v869_v3 }
 0x10e   : > { %v1339_v21 = vadd.f32 %v1320_v16, %v1892_v30  ;;  %v1312_v12 = vadd.f32 %v1985_v47, %v1289_v17  ;;  %v705_v34 = vadd.f32 %v1942_v63, %v704_v42  ;;  %v765_v38 = vadd.f32 %v1980_v46, %v745_v44  ;;  %v1020_v10 = vpop.permute.xlu0 %1019 }
 0x10f   : > { %1667 = vrcp.f32 %v922_v27  ;;  %v1536_v29 = vmul.f32 -1.442695, %v864_v20  ;;  %v1284_v35 = vmul.f32 %v1962_v23, %v864_v20  ;;  %v737_v40 = vadd.f32 %v1942_v63, %v736_v25 }
 0x110   : > { %1669 = vrcp.f32 %v932_v14  ;;  %1355 = vst [vmem:[%s2009_s16 + $0x20] sm:$0xff] %v1339_v21  ;;  %v1328_v39 = vmax.f32 %v1312_v12, 0.0  ;;  %v755_v36 = vadd.f32 %v1980_v46, %v705_v34  ;;  %v872_v41 = vadd.f32 %v1990_v51, %v765_v38  ;;  %v1024_v1 = vpop.permute.xlu1 %1023 }
 0x111   : > { %v1650_v15 = vpop.eup %1649  ;;  %1671 = vpow2.f32 %v1536_v29  ;;  %v1307_v30 = vadd.f32 %v1985_v47, %v1284_v35  ;;  %v763_v53 = vadd.f32 %v1980_v46, %v737_v40 }
 0x112   : > { %v1652_v48 = vpop.eup %1651  ;;  %v930_v28 = vadd.f32 1.0, %v1650_v15  ;;  %v1347_v7 = vadd.f32 %v1328_v39, %v1898_v32  ;;  %v862_v50 = vadd.f32 %v1973_v37, %v755_v36  ;;  %1673 = vpow2.f32 %v1541_v22  ;;  %v1031_v22 = vpop.permute.xlu0 %1030 }
 0x113   : > { %v1654_v63 = vpop.eup %1653  ;;  %v1323_v57 = vmax.f32 %v1307_v30, 0.0  ;;  %v1544_v24 = vmul.f32 -1.442695, %v872_v41  ;;  %v1292_v58 = vmul.f32 %v1962_v23, %v872_v41  ;;  %v870_v37 = vadd.f32 %v2059_v49, %v763_v53 }
 0x114   : > { %1675 = vrcp.f32 %v930_v28  ;;  %1363 = vst [vmem:[%s2009_s16 + $0x60] sm:$0xff] %v1347_v7  ;;  %v1534_v51 = vmul.f32 -1.442695, %v862_v50  ;;  %v1282_v32 = vmul.f32 %v1962_v23, %v862_v50  ;;  %v1035_v21 = vpop.permute.xlu1 %1034  ;;  %v2131_v28 = vld [vmem:[%s2187_s5] sm:$0xff] }
 0x115   : > { %v1656_v13 = vpop.eup %1655  ;;  %v1342_v46 = vadd.f32 %v1323_v57, %v1919_v43  ;;  %1677 = vpow2.f32 %v1544_v24  ;;  %v1315_v4 = vadd.f32 %v1985_v47, %v1292_v58  ;;  %v1542_v6 = vmul.f32 -1.442695, %v870_v37 }
 0x116   : > { %v1658_v52 = vpop.eup %1657  ;;  %1679 = vpow2.f32 %v1534_v51  ;;  %v1305_v59 = vadd.f32 %v1985_v47, %v1282_v32  ;;  %v1290_v60 = vmul.f32 %v1962_v23, %v870_v37  ;;  %v927_v14 = vadd.f32 1.0, %v1656_v13  ;;  %v1042_v13 = vpop.permute.xlu0 %1041 }
 0x117   : > { %v1660_v61 = vpop.eup %1659  ;;  %1358 = vst [vmem:[%s2009_s16 + $0x38] sm:$0xff] %v1342_v46  ;;  %v1331_v8 = vmax.f32 %v1315_v4, 0.0  ;;  %1681 = vpow2.f32 %v1542_v6 }
 0x118   : > { %v1662_v0 = vpop.eup %1661  ;;  %v1321_v49 = vmax.f32 %v1305_v59, 0.0  ;;  %v1313_v43 = vadd.f32 %v1985_v47, %v1290_v60  ;;  %v1060_v47 = vmul.f32 %v1652_v48, %v2033_v62  ;;  %1683 = vrcp.f32 %v927_v14  ;;  %v1046_v6 = vpop.permute.xlu1 %1045 }
 0x119   : > { %v1664_v3 = vpop.eup %1663  ;;  %v1350_v2 = vadd.f32 %v1331_v8, %v1925_v45  ;;  %v935_v17 = vadd.f32 1.0, %v1662_v0  ;;  %v1058_v45 = vmul.f32 %v1658_v52, %v2039_v11  ;;  %v1068_v62 = vmul.f32 %v1654_v63, %v1031_v22  ;;  %v2126_v11 = vld [vmem:[%s2187_s5 + $0x8] sm:$0xff] }
 0x11a   : > { %v1666_v5 = vpop.eup %1665  ;;  %v1340_v42 = vadd.f32 %v1321_v49, %v1895_v31  ;;  %v1329_v23 = vmax.f32 %v1313_v43, 0.0  ;;  %v1061_v9 = vmul.f32 %v1664_v3, %v2061_v26  ;;  %v1066_v7 = vmul.f32 %v1660_v61, %v1020_v10 }
 0x11b   : > { %1366 = vst [vmem:[%s2009_s16 + $0x78] sm:$0xff] %v1350_v2  ;;  %1685 = vrcp.f32 %v935_v17  ;;  %v925_v34 = vadd.f32 1.0, %v1666_v5  ;;  %v1086_v58 = vmul.f32 %v2131_v28, %v1068_v62  ;;  %v1078_v51 = vmul.f32 %v2131_v28, %v1060_v47 }
 0x11c   : > { %v1668_v16 = vpop.eup %1667  ;;  %1356 = vst [vmem:[%s2009_s16 + $0x28] sm:$0xff] %v1340_v42  ;;  %v1348_v27 = vadd.f32 %v1329_v23, %v1901_v33  ;;  %v1155_v31 = vadd.f32 %v1061_v9, %v1060_v47  ;;  %v1079_v63 = vmul.f32 %v2126_v11, %v1061_v9  ;;  %v1053_v42 = vpop.permute.xlu0 %1052 }
 0x11d   : > { %v1670_v20 = vpop.eup %1669  ;;  %v1059_v44 = vmul.f32 %v1668_v16, %v2064_v55  ;;  %v1057_v47 = vpop.permute.xlu1 %1056 }
 0x11e   : > { %v1672_v25 = vpop.eup %1671  ;;  %1364 = vst [vmem:[%s2009_s16 + $0x68] sm:$0xff] %v1348_v27  ;;  %v1069_v33 = vmul.f32 %v1670_v20, %v1035_v21  ;;  %v1156_v39 = vrot.slane %v1155_v31, 4  ;;  %v1099_v4 = vadd.f32 %v1079_v63, %v1078_v51  ;;  %s524_s16 = scalar_lea.vmem %s2182_s0, %s1831_s28 }
 0x11f   : > { %v928_v26 = vadd.f32 1.0, %v1672_v25  ;;  %v1674_v12 = vpop.eup %1673  ;;  %v1148_v29 = vadd.f32 %v1059_v44, %v1058_v45  ;;  %v1077_v60 = vmul.f32 %v2126_v11, %v1059_v44 }
 0x120   : > { %v933_v36 = vadd.f32 1.0, %v1674_v12  ;;  %v1183_v50 = vadd.f32 %v1069_v33, %v1068_v62  ;;  %v1157_v57 = vadd.f32 %v1156_v39, %v1155_v31  ;;  %v1087_v24 = vmul.f32 %v2126_v11, %v1069_v33 }
 0x121   : > { %v1676_v35 = vpop.eup %1675  ;;  %1687 = vrcp.f32 %v928_v26  ;;  %v1149_v30 = vrot.slane %v1148_v29, 4  ;;  %v1100_v2 = vrot.slane %v1099_v4, 4  ;;  %v1084_v12 = vmul.f32 %v2131_v28, %v1066_v7 }
 0x122   : > { %v1678_v38 = vpop.eup %1677  ;;  %1689 = vrcp.f32 %v925_v34  ;;  %v1067_v41 = vmul.f32 %v1676_v35, %v1024_v1  ;;  %v1184_v46 = vrot.slane %v1183_v50, 4  ;;  %v1158_v52 = vrot.slane %v1157_v57, 2 }
 0x123   : > { %v1680_v55 = vpop.eup %1679  ;;  %v936_v40 = vadd.f32 1.0, %v1678_v38  ;;  %v1150_v32 = vadd.f32 %v1149_v30, %v1148_v29  ;;  %v1127_v61 = vadd.f32 %v1087_v24, %v1086_v58  ;;  %v1076_v1 = vmul.f32 %v2131_v28, %v1058_v45 }
 0x124   : > { %v926_v15 = vadd.f32 1.0, %v1680_v55  ;;  %v1682_v48 = vpop.eup %1681  ;;  %v1176_v37 = vadd.f32 %v1067_v41, %v1066_v7  ;;  %v1185_v10 = vadd.f32 %v1184_v46, %v1183_v50  ;;  %v1159_v5 = vadd.f32 %v1158_v52, %v1157_v57 }
 0x125   : > { %1691 = vrcp.f32 %v936_v40  ;;  %v934_v53 = vadd.f32 1.0, %v1682_v48  ;;  %v1684_v8 = vpop.eup %1683  ;;  %v1151_v0 = vrot.slane %v1150_v32, 2  ;;  %v1092_v23 = vadd.f32 %v1077_v60, %v1076_v1 }
 0x126   : > { %1693 = vrcp.f32 %v926_v15  ;;  %v1177_v59 = vrot.slane %v1176_v37, 4  ;;  %v1064_v14 = vmul.f32 %v1684_v8, %v2101_v56  ;;  %v1128_v16 = vrot.slane %v1127_v61, 4 }
 0x127   : > { %1695 = vrcp.f32 %v933_v36  ;;  %v1152_v17 = vadd.f32 %v1151_v0, %v1150_v32  ;;  %v1186_v25 = vrot.slane %v1185_v10, 2  ;;  %v2141_v45 = vadd.f32 %v1100_v2, %v1099_v4 }
 0x128   : > { %1697 = vrcp.f32 %v934_v53  ;;  %v1178_v49 = vadd.f32 %v1177_v59, %v1176_v37  ;;  %v1686_v43 = vpop.eup %1685  ;;  %v1160_v22 = vrot.slane %v1159_v5, 1  ;;  %v1085_v26 = vmul.f32 %v2126_v11, %v1067_v41 }
 0x129   : > { %v1072_v31 = vmul.f32 %v1686_v43, %v1053_v42  ;;  %v2145_v56 = vadd.f32 %v1128_v16, %v1127_v61  ;;  %v1153_v62 = vrot.slane %v1152_v17, 1  ;;  %v1082_v40 = vmul.f32 %v2131_v28, %v1064_v14 }
 0x12a   : > { %v1179_v27 = vrot.slane %v1178_v49, 2  ;;  %v1187_v30 = vadd.f32 %v1186_v25, %v1185_v10  ;;  %v1161_v48 = vadd.f32 %v1160_v22, %v1159_v5  ;;  %v1120_v53 = vadd.f32 %v1085_v26, %v1084_v12 }
 0x12b   : > { %v1090_v8 = vmul.f32 %v2131_v28, %v1072_v31 }
 0x12c   : > { %v1180_v55 = vadd.f32 %v1179_v27, %v1178_v49  ;;  %v1188_v46 = vrot.slane %v1187_v30, 1 }
 0x12e   : > { %v1688_v3 = vpop.eup %1687  ;;  %v1181_v32 = vrot.slane %v1180_v55, 1 }
 0x12f   : > { %v1065_v9 = vmul.f32 %v1688_v3, %v2099_v54  ;;  %v1690_v20 = vpop.eup %1689  ;;  %v1093_v54 = vrot.slane %v1092_v23, 4 }
 0x130   : > { %v1062_v39 = vmul.f32 %v1690_v20, %v2081_v19  ;;  %v1182_v10 = vadd.f32 %v1181_v32, %v1180_v55  ;;  %v1121_v20 = vrot.slane %v1120_v53, 4 }
 0x131   : > { %v1169_v44 = vadd.f32 %v1065_v9, %v1064_v14  ;;  %v1083_v63 = vmul.f32 %v2126_v11, %v1065_v9  ;;  %v1094_v2 = vadd.f32 %v1093_v54, %v1092_v23 }
 0x132   : > { %v1692_v21 = vpop.eup %1691  ;;  %v1080_v19 = vmul.f32 %v2131_v28, %v1062_v39 }
 0x133   : > { %v1694_v34 = vpop.eup %1693  ;;  %v1170_v29 = vrot.slane %v1169_v44, 4  ;;  %v1073_v35 = vmul.f32 %v1692_v21, %v1057_v47  ;;  %v1113_v0 = vadd.f32 %v1083_v63, %v1082_v40  ;;  %v1095_v22 = vrot.slane %v1094_v2, 2 }
 0x134   : > { %v1696_v33 = vpop.eup %1695  ;;  %v1063_v38 = vmul.f32 %v1694_v34, %v2079_v18  ;;  %v1154_v18 = vadd.f32 %v1153_v62, %v1152_v17 }
 0x135   : > { %v1698_v36 = vpop.eup %1697  ;;  %v1171_v15 = vadd.f32 %v1170_v29, %v1169_v44  ;;  %v1197_v41 = vadd.f32 %v1073_v35, %v1072_v31  ;;  %v1070_v58 = vmul.f32 %v1696_v33, %v1042_v13  ;;  %v1091_v13 = vmul.f32 %v2126_v11, %v1073_v35 }
 0x136   : > { %v1081_v7 = vmul.f32 %v2126_v11, %v1063_v38  ;;  %v1162_v50 = vadd.f32 %v1063_v38, %v1062_v39  ;;  %v1071_v24 = vmul.f32 %v1698_v36, %v1046_v6  ;;  %v1206_v6 = vadd.f32 1e-06, %v1161_v48 }
 0x137   : > { %v1172_v57 = vrot.slane %v1171_v15, 2  ;;  %v1198_v52 = vrot.slane %v1197_v41, 4  ;;  %v1088_v3 = vmul.f32 %v2131_v28, %v1070_v58  ;;  %v1205_v5 = vadd.f32 1e-06, %v1154_v18 }
 0x138   : > { %v1163_v51 = vrot.slane %v1162_v50, 4  ;;  %v1190_v4 = vadd.f32 %v1071_v24, %v1070_v58  ;;  %v1106_v59 = vadd.f32 %v1081_v7, %v1080_v19  ;;  %v1089_v61 = vmul.f32 %v2126_v11, %v1071_v24 }
 0x139   : > { %v1173_v37 = vadd.f32 %v1172_v57, %v1171_v15  ;;  %v1199_v9 = vadd.f32 %v1198_v52, %v1197_v41  ;;  %v1114_v47 = vrot.slane %v1113_v0, 4  ;;  %v1189_v44 = vadd.f32 %v1188_v46, %v1187_v30 }
 0x13a   : > { %v1164_v60 = vadd.f32 %v1163_v51, %v1162_v50  ;;  %v1191_v43 = vrot.slane %v1190_v4, 4  ;;  %v1107_v14 = vrot.slane %v1106_v59, 4  ;;  %v1134_v17 = vadd.f32 %v1089_v61, %v1088_v3 }
 0x13b   : > { %v1174_v49 = vrot.slane %v1173_v37, 1  ;;  %v1141_v25 = vadd.f32 %v1091_v13, %v1090_v8  ;;  %1699 = vrcp.f32 %v1206_v6  ;;  %v1209_v11 = vadd.f32 1e-06, %v1182_v10 }
 0x13c   : > { %v1165_v1 = vrot.slane %v1164_v60, 2  ;;  %v1192_v27 = vadd.f32 %v1191_v43, %v1190_v4  ;;  %1701 = vrcp.f32 %v1205_v5  ;;  %v1200_v28 = vrot.slane %v1199_v9, 2 }
 0x13d   : > { %v1175_v42 = vadd.f32 %v1174_v49, %v1173_v37  ;;  %v1108_v23 = vadd.f32 %v1107_v14, %v1106_v59  ;;  %v1135_v34 = vrot.slane %v1134_v17, 4  ;;  %v1115_v29 = vadd.f32 %v1114_v47, %v1113_v0 }
 0x13e   : > { %v1166_v16 = vadd.f32 %v1165_v1, %v1164_v60  ;;  %v1193_v21 = vrot.slane %v1192_v27, 2  ;;  %v1210_v35 = vadd.f32 1e-06, %v1189_v44  ;;  %v1142_v33 = vrot.slane %v1141_v25, 4 }
 0x13f   : > { %v1208_v26 = vadd.f32 1e-06, %v1175_v42  ;;  %v1201_v62 = vadd.f32 %v1200_v28, %v1199_v9  ;;  %v1122_v39 = vadd.f32 %v1121_v20, %v1120_v53  ;;  %1703 = vrcp.f32 %v1209_v11 }
 0x140   : > { %v1167_v31 = vrot.slane %v1166_v16, 1  ;;  %v1194_v54 = vadd.f32 %v1193_v21, %v1192_v27  ;;  %v1102_v36 = vrot.slane %v2141_v45, 2  ;;  %v1096_v40 = vadd.f32 %v1095_v22, %v1094_v2 }
 0x141   : > { %1705 = vrcp.f32 %v1208_v26  ;;  %v1202_v15 = vrot.slane %v1201_v62, 1  ;;  %v1109_v30 = vrot.slane %v1108_v23, 2  ;;  %v1136_v41 = vadd.f32 %v1135_v34, %v1134_v17 }
 0x142   : > { %v1168_v12 = vadd.f32 %v1167_v31, %v1166_v16  ;;  %v1195_v55 = vrot.slane %v1194_v54, 1  ;;  %v1116_v7 = vrot.slane %v1115_v29, 2  ;;  %v1143_v50 = vadd.f32 %v1142_v33, %v1141_v25 }
 0x143   : > { %v1203_v63 = vadd.f32 %v1202_v15, %v1201_v62  ;;  %v1123_v57 = vrot.slane %v1122_v39, 2  ;;  %v1103_v58 = vadd.f32 %v1102_v36, %v2141_v45  ;;  %v1130_v53 = vrot.slane %v2145_v56, 2  ;;  %v1546_v36 = vld [vmem:[%s2192_s10] ss:$0 sm:$0xff] }
 0x144   : > { %v1207_v38 = vadd.f32 1e-06, %v1168_v12  ;;  %v1196_v48 = vadd.f32 %v1195_v55, %v1194_v54  ;;  %v1110_v19 = vadd.f32 %v1109_v30, %v1108_v23  ;;  %v1137_v51 = vrot.slane %v1136_v41, 2  ;;  %v1332_v30 = vld [vmem:[%s524_s16] sm:$0xff] }
 0x145   : > { %v1212_v18 = vadd.f32 1e-06, %v1203_v63  ;;  %v1097_v32 = vrot.slane %v1096_v40, 1  ;;  %v1117_v37 = vadd.f32 %v1116_v7, %v1115_v29  ;;  %v1144_v46 = vrot.slane %v1143_v50, 2 }
 0x146   : > { %1707 = vrcp.f32 %v1207_v38  ;;  %v1211_v24 = vadd.f32 1e-06, %v1196_v48  ;;  %v1124_v4 = vadd.f32 %v1123_v57, %v1122_v39  ;;  %v1104_v59 = vrot.slane %v1103_v58, 1  ;;  %v1545_v38 = vld [vmem:[%s2191_s9] ss:$0 sm:$0xff] }
 0x147   : > { %1709 = vrcp.f32 %v1210_v35  ;;  %v1131_v60 = vadd.f32 %v1130_v53, %v2145_v56  ;;  %v1111_v8 = vrot.slane %v1110_v19, 1  ;;  %v1138_v0 = vadd.f32 %v1137_v51, %v1136_v41  ;;  %v1204_v35 = vld [vmem:[%s539_s23] sm:$0xff] }
 0x148   : > { %1711 = vrcp.f32 %v1211_v24  ;;  %v1700_v52 = vpop.eup %1699  ;;  %v1098_v49 = vadd.f32 %v1097_v32, %v1096_v40  ;;  %v1118_v45 = vrot.slane %v1117_v37, 1  ;;  %v1145_v43 = vadd.f32 %v1144_v46, %v1143_v50 }
 0x149   : > { %1713 = vrcp.f32 %v1212_v18  ;;  %v1702_v61 = vpop.eup %1701  ;;  %v1125_v13 = vrot.slane %v1124_v4, 1  ;;  %v1105_v1 = vadd.f32 %v1104_v59, %v1103_v58  ;;  %v1132_v3 = vrot.slane %v1131_v60, 1 }
 0x14a   : > { %v1221_v10 = vmul.f32 %v1702_v61, %v1098_v49  ;;  %v1112_v5 = vadd.f32 %v1111_v8, %v1110_v19  ;;  %v1139_v42 = vrot.slane %v1138_v0, 1  ;;  %v1119_v56 = vadd.f32 %v1118_v45, %v1117_v37 }
 0x14b   : > { %v1222_v14 = vmul.f32 %v1700_v52, %v1105_v1  ;;  %v1146_v16 = vrot.slane %v1145_v43, 1  ;;  %v1126_v47 = vadd.f32 %v1125_v13, %v1124_v4  ;;  %v1133_v25 = vadd.f32 %v1132_v3, %v1131_v60 }
 0x14c   : > { %v1704_v6 = vpop.eup %1703  ;;  %v1140_v21 = vadd.f32 %v1139_v42, %v1138_v0 }
 0x14d   : > { %v1238_v20 = vsel %vm1237_vm0, %v1222_v14, %v1221_v10  ;;  %v1225_v11 = vmul.f32 %v1704_v6, %v1126_v47  ;;  %v1147_v23 = vadd.f32 %v1146_v16, %v1145_v43 }
 0x14e   : > { %v1706_v2 = vpop.eup %1705 }
 0x14f   : > { %v1224_v44 = vmul.f32 %v1706_v2, %v1119_v56 }
 0x153   : > { %v1708_v9 = vpop.eup %1707 }
 0x154   : > { %v1710_v17 = vpop.eup %1709  ;;  %v1223_v27 = vmul.f32 %v1708_v9, %v1112_v5 }
 0x155   : > { %v1712_v22 = vpop.eup %1711  ;;  %v1226_v28 = vmul.f32 %v1710_v17, %v1133_v25 }
 0x156   : > { %v1240_v31 = vsel %vm1239_vm1, %v1223_v27, %v1238_v20  ;;  %v1714_v12 = vpop.eup %1713  ;;  %v1227_v54 = vmul.f32 %v1712_v22, %v1140_v21 }
 0x157   : > { %v1242_v26 = vsel %vm1241_vm2, %v1224_v44, %v1240_v31  ;;  %v1228_v33 = vmul.f32 %v1714_v12, %v1147_v23 }
 0x158   : > { %v1244_v34 = vsel %vm1243_vm3, %v1225_v11, %v1242_v26 }
 0x159   : > { %v1246_v29 = vsel %vm1245_vm4, %v1226_v28, %v1244_v34 }
 0x15a   : > { %v1248_v62 = vsel %vm1247_vm5, %v1227_v54, %v1246_v29 }
 0x15b   : > { %v1250_v39 = vsel %vm1249_vm6, %v1228_v33, %v1248_v62 }
 0x15c   : > { %v1252_v55 = vadd.f32 %v1250_v39, %v1204_v35 }
 0x15e   : > { %v1260_v40 = vmul.f32 %v1545_v38, %v1252_v55 }
 0x160   : > { %v1268_v15 = vadd.f32 %v1546_v36, %v1260_v40 }
 0x162   : > { %v1269_v41 = vmax.f32 %v1268_v15, 0.0 }
 0x164   : > { %v1333_v48 = vadd.f32 %v1332_v30, %v1269_v41 }
 0x166   : > { %1334 = vst [vmem:[%s547_s18] sm:$0xff] %v1333_v48 }
 0x167 PF: > { %s25_s29 = sadd.s32 1, %s1721_s29  }
 0x168   : > { %p22_p5 = scmp.ge.s32.totalorder %s25_s29, 4  }
 0x16a   :  { %24 = sbr.rel (!%p22_p5) target bundleno = 1 (0x1), region = 126 }

// kernel: encoder_forward.11
= control target key start
LH: loop header
LB: loop body
LE: loop exit
PB: predicated region body
PF: predicated region fallthrough
CT: control target
= control target key end

     0   :  { %v698_v0 = vmov 0.0   ;;  %vm699_vm0 = vmmov 0   ;;  %s943_s1 = inlined_call_operand.vmem [shape: bf16[128,128], index: 1, kind: input, shape index: {}]   ;;  %s944_s3 = inlined_call_operand.vmem [shape: bf16[128,128], index: 3, kind: input, shape index: {}]   ;;  %s945_s5 = inlined_call_operand.vmem [shape: bf16[128,128], index: 5, kind: input, shape index: {}]   ;;  %s946_s7 = inlined_call_operand.vmem [shape: bf16[128,128], index: 7, kind: input, shape index: {}]   ;;  %s947_s0 = inlined_call_operand.vmem [shape: f32[16,128], index: 0, kind: input, shape index: {}]   ;;  %s948_s2 = inlined_call_operand.vmem [shape: f32[1,128], index: 2, kind: input, shape index: {}]   ;;  %s949_s4 = inlined_call_operand.vmem [shape: f32[1,128], index: 4, kind: input, shape index: {}]   ;;  %s950_s9 = inlined_call_operand.vmem [shape: f32[16,128], index: 9, kind: output, shape index: {0}]   ;;  %s951_s10 = inlined_call_operand.vmem [shape: f32[16,128], index: 10, kind: output, shape index: {1}]   ;;  %s952_s6 = inlined_call_operand.vmem [shape: f32[1,128], index: 6, kind: input, shape index: {}]   ;;  %s953_s8 = inlined_call_operand.vmem [shape: f32[1,128], index: 8, kind: input, shape index: {}]   ;;  %s954_s11 = inlined_call_operand.vmem [shape: f32[16,128], index: 11, kind: output, shape index: {2}]   ;;  %s955_s12 = inlined_call_operand.vmem [shape: f32[16,128], index: 12, kind: output, shape index: {3}]  }
   0x1   :  { %584 = vmatprep.subr.bf16.mxu0 %v698_v0  ;;  %604 = vmatprep.subr.bf16.mxu1 %v698_v0  ;;  %v666_v1 = vld [vmem:[%s943_s1 + $0x38] sm:$0xff]   ;;  %v668_v3 = vld [vmem:[%s943_s1 + $0x30] sm:$0xff]   ;;  %v670_v5 = vld [vmem:[%s943_s1 + $0x28] sm:$0xff]  }
   0x2   :  { %v667_v2 = vld [vmem:[%s944_s3 + $0x38] sm:$0xff]   ;;  %600 = vmatprep.mubr.msk.bf16.mxu0 %vm699_vm0, %v698_v0  ;;  %620 = vmatprep.mubr.msk.bf16.mxu1 %vm699_vm0, %v698_v0  ;;  %v669_v4 = vld [vmem:[%s944_s3 + $0x30] sm:$0xff]   ;;  %v671_v6 = vld [vmem:[%s944_s3 + $0x28] sm:$0xff]  }
   0x3   :  { %585 = vmatpush3.bf16.msra.mxu0 %v666_v1  ;;  %605 = vmatpush3.bf16.msra.mxu1 %v667_v2  ;;  %v672_v7 = vld [vmem:[%s943_s1 + $0x20] sm:$0xff]   ;;  %v674_v9 = vld [vmem:[%s943_s1 + $0x18] sm:$0xff]   ;;  %v676_v11 = vld [vmem:[%s943_s1 + $0x10] sm:$0xff]  }
   0x4   :  { %586 = vmatprep.subr.bf16.mxu0 %v698_v0  ;;  %606 = vmatprep.subr.bf16.mxu1 %v698_v0  ;;  %v673_v8 = vld [vmem:[%s944_s3 + $0x20] sm:$0xff]   ;;  %v675_v10 = vld [vmem:[%s944_s3 + $0x18] sm:$0xff]   ;;  %v677_v12 = vld [vmem:[%s944_s3 + $0x10] sm:$0xff]  }
   0x5   :  { %v678_v13 = vld [vmem:[%s943_s1 + $0x8] sm:$0xff]   ;;  %v680_v15 = vld [vmem:[%s943_s1] sm:$0xff]   ;;  %v682_v20 = vld [vmem:[%s945_s5 + $0x38] sm:$0xff]  }
   0x6   :  { %v679_v14 = vld [vmem:[%s944_s3 + $0x8] sm:$0xff]   ;;  %v37_v16 = vld [vmem:[%s947_s0] sm:$0xff]  ;;  %v683_v21 = vld [vmem:[%s946_s7 + $0x38] sm:$0xff]  }
   0x7   :  { %587 = vmatpush3.bf16.msra.mxu0 %v668_v3  ;;  %607 = vmatpush3.bf16.msra.mxu1 %v669_v4  ;;  %v38_v17 = vld [vmem:[%s947_s0 + $0x8] sm:$0xff]  ;;  %v681_v18 = vld [vmem:[%s944_s3] sm:$0xff]   ;;  %v684_v22 = vld [vmem:[%s945_s5 + $0x30] sm:$0xff]  }
   0x8   :  { %588 = vmatprep.subr.bf16.mxu0 %v698_v0  ;;  %608 = vmatprep.subr.bf16.mxu1 %v698_v0  ;;  %v39_v19 = vpack.c.bf16 %v38_v17, %v37_v16  ;;  %v685_v23 = vld [vmem:[%s946_s7 + $0x30] sm:$0xff]   ;;  %v686_v24 = vld [vmem:[%s945_s5 + $0x28] sm:$0xff]   ;;  %v688_v26 = vld [vmem:[%s945_s5 + $0x20] sm:$0xff]  }
   0x9   :  { %v687_v25 = vld [vmem:[%s946_s7 + $0x28] sm:$0xff]   ;;  %v689_v27 = vld [vmem:[%s946_s7 + $0x20] sm:$0xff]   ;;  %v690_v28 = vld [vmem:[%s945_s5 + $0x18] sm:$0xff]  }
   0xa   :  { %v691_v29 = vld [vmem:[%s946_s7 + $0x18] sm:$0xff]   ;;  %v692_v30 = vld [vmem:[%s945_s5 + $0x10] sm:$0xff]   ;;  %v694_v32 = vld [vmem:[%s945_s5 + $0x8] sm:$0xff]  }
   0xb   :  { %589 = vmatpush3.bf16.msra.mxu0 %v670_v5  ;;  %609 = vmatpush3.bf16.msra.mxu1 %v671_v6  ;;  %v693_v31 = vld [vmem:[%s946_s7 + $0x10] sm:$0xff]   ;;  %v695_v33 = vld [vmem:[%s946_s7 + $0x8] sm:$0xff]   ;;  %v696_v34 = vld [vmem:[%s945_s5] sm:$0xff]  }
   0xc   :  { %590 = vmatprep.subr.bf16.mxu0 %v698_v0  ;;  %610 = vmatprep.subr.bf16.mxu1 %v698_v0  ;;  %v697_v35 = vld [vmem:[%s946_s7] sm:$0xff]  }
   0xd   :  { %v512_v36 = vld [vmem:[%s948_s2] ss:$0 sm:$0xff] }
   0xe   :  { %v521_v37 = vld [vmem:[%s949_s4] ss:$0 sm:$0xff] }
   0xf   :  { %591 = vmatpush3.bf16.msra.mxu0 %v672_v7  ;;  %611 = vmatpush3.bf16.msra.mxu1 %v673_v8  ;;  %v530_v50 = vld [vmem:[%s952_s6] ss:$0 sm:$0xff] }
  0x10   :  { %592 = vmatprep.subr.bf16.mxu0 %v698_v0  ;;  %612 = vmatprep.subr.bf16.mxu1 %v698_v0  ;;  %v539_v51 = vld [vmem:[%s953_s8] ss:$0 sm:$0xff] }
  0x13   :  { %593 = vmatpush3.bf16.msra.mxu0 %v674_v9  ;;  %613 = vmatpush3.bf16.msra.mxu1 %v675_v10 }
  0x14   :  { %594 = vmatprep.subr.bf16.mxu0 %v698_v0  ;;  %614 = vmatprep.subr.bf16.mxu1 %v698_v0 }
  0x17   :  { %595 = vmatpush3.bf16.msra.mxu0 %v676_v11  ;;  %615 = vmatpush3.bf16.msra.mxu1 %v677_v12 }
  0x18   :  { %596 = vmatprep.subr.bf16.mxu0 %v698_v0  ;;  %616 = vmatprep.subr.bf16.mxu1 %v698_v0 }
  0x1b   :  { %597 = vmatpush3.bf16.msra.mxu0 %v678_v13  ;;  %617 = vmatpush3.bf16.msra.mxu1 %v679_v14 }
  0x1c   :  { %598 = vmatprep.subr.bf16.mxu0 %v698_v0  ;;  %618 = vmatprep.subr.bf16.mxu1 %v698_v0 }
  0x1f   :  { %599 = vmatpush3.bf16.msra.mxu0 %v680_v15  ;;  %619 = vmatpush3.bf16.msra.mxu1 %v681_v18 }
  0x20   :  { %624 = vmatprep.subr.bf16.mxu0 %v698_v0  ;;  %644 = vmatprep.subr.bf16.mxu1 %v698_v0 }
  0x22   :  { %601 = vmatmul.mubr.bf16.vlgmr.msra.gmra.mxu0 %v39_v19  ;;  %621 = vmatmul.mubr.bf16.vlgmr.msra.gmra.mxu1 %v39_v19 }
  0x23   :  { %625 = vmatpush3.bf16.msra.mxu0 %v682_v20  ;;  %645 = vmatpush3.bf16.msra.mxu1 %v683_v21 }
  0x24   :  { %626 = vmatprep.subr.bf16.mxu0 %v698_v0  ;;  %646 = vmatprep.subr.bf16.mxu1 %v698_v0 }
  0x25   :  { %640 = vmatprep.mubr.msk.bf16.mxu0 %vm699_vm0, %v698_v0  ;;  %660 = vmatprep.mubr.msk.bf16.mxu1 %vm699_vm0, %v698_v0 }
  0x27   :  { %627 = vmatpush3.bf16.msra.mxu0 %v684_v22  ;;  %647 = vmatpush3.bf16.msra.mxu1 %v685_v23 }
  0x28   :  { %628 = vmatprep.subr.bf16.mxu0 %v698_v0  ;;  %648 = vmatprep.subr.bf16.mxu1 %v698_v0 }
  0x2b   :  { %629 = vmatpush3.bf16.msra.mxu0 %v686_v24  ;;  %649 = vmatpush3.bf16.msra.mxu1 %v687_v25 }
  0x2c   :  { %630 = vmatprep.subr.bf16.mxu0 %v698_v0  ;;  %650 = vmatprep.subr.bf16.mxu1 %v698_v0 }
  0x2f   :  { %631 = vmatpush3.bf16.msra.mxu0 %v688_v26  ;;  %651 = vmatpush3.bf16.msra.mxu1 %v689_v27 }
  0x30   :  { %632 = vmatprep.subr.bf16.mxu0 %v698_v0  ;;  %652 = vmatprep.subr.bf16.mxu1 %v698_v0 }
  0x33   :  { %633 = vmatpush3.bf16.msra.mxu0 %v690_v28  ;;  %653 = vmatpush3.bf16.msra.mxu1 %v691_v29 }
  0x34   :  { %634 = vmatprep.subr.bf16.mxu0 %v698_v0  ;;  %654 = vmatprep.subr.bf16.mxu1 %v698_v0 }
  0x37   :  { %635 = vmatpush3.bf16.msra.mxu0 %v692_v30  ;;  %655 = vmatpush3.bf16.msra.mxu1 %v693_v31 }
  0x38   :  { %636 = vmatprep.subr.bf16.mxu0 %v698_v0  ;;  %656 = vmatprep.subr.bf16.mxu1 %v698_v0 }
  0x3b   :  { %637 = vmatpush3.bf16.msra.mxu0 %v694_v32  ;;  %657 = vmatpush3.bf16.msra.mxu1 %v695_v33 }
  0x3c   :  { %638 = vmatprep.subr.bf16.mxu0 %v698_v0  ;;  %658 = vmatprep.subr.bf16.mxu1 %v698_v0 }
  0x3f   :  { %639 = vmatpush3.bf16.msra.mxu0 %v696_v34  ;;  %659 = vmatpush3.bf16.msra.mxu1 %v697_v35 }
  0x42   :  { %641 = vmatmul.mubr.bf16.vlgmr.msra.gmra.mxu0 %v39_v19  ;;  %661 = vmatmul.mubr.bf16.vlgmr.msra.gmra.mxu1 %v39_v19 }
  0xe2   :  { %v145_v38 = vpop.f32.mrf.mxu0  ;;  %v259_v40 = vpop.f32.mrf.mxu1 }
  0xe3   :  { %v146_v39 = vadd.f32 %v512_v36, %v145_v38  ;;  %v260_v41 = vadd.f32 %v521_v37, %v259_v40 }
  0xe4   :  { %v602_v42 = vpop.f32.mrf.mxu0  ;;  %v622_v43 = vpop.f32.mrf.mxu1 }
  0xe5   :  { %152 = vst [vmem:[%s950_s9] sm:$0xff] %v146_v39  ;;  %266 = vst [vmem:[%s951_s10] sm:$0xff] %v260_v41 }
  0xe6   :  { %v148_v44 = vpop.f32.mrf.mxu0  ;;  %v262_v46 = vpop.f32.mrf.mxu1 }
  0xe7   :  { %v149_v45 = vadd.f32 %v512_v36, %v148_v44  ;;  %v263_v47 = vadd.f32 %v521_v37, %v262_v46 }
  0xe8   :  { %v603_v48 = vpop.f32.mrf.mxu0  ;;  %v623_v49 = vpop.f32.mrf.mxu1 }
  0xe9   :  { %153 = vst [vmem:[%s950_s9 + $0x8] sm:$0xff] %v149_v45  ;;  %267 = vst [vmem:[%s951_s10 + $0x8] sm:$0xff] %v263_v47 }
 0x102   :  { %v373_v52 = vpop.f32.mrf.mxu0  ;;  %v487_v54 = vpop.f32.mrf.mxu1 }
 0x103   :  { %v374_v53 = vadd.f32 %v530_v50, %v373_v52  ;;  %v488_v55 = vadd.f32 %v539_v51, %v487_v54 }
 0x104   :  { %v642_v56 = vpop.f32.mrf.mxu0  ;;  %v662_v57 = vpop.f32.mrf.mxu1 }
 0x105   :  { %380 = vst [vmem:[%s954_s11] sm:$0xff] %v374_v53  ;;  %494 = vst [vmem:[%s955_s12] sm:$0xff] %v488_v55 }
 0x106   :  { %v376_v58 = vpop.f32.mrf.mxu0  ;;  %v490_v60 = vpop.f32.mrf.mxu1 }
 0x107   :  { %v377_v59 = vadd.f32 %v530_v50, %v376_v58  ;;  %v491_v61 = vadd.f32 %v539_v51, %v490_v60 }
 0x108   :  { %v643_v62 = vpop.f32.mrf.mxu0  ;;  %v663_v63 = vpop.f32.mrf.mxu1 }
 0x109   :  { %381 = vst [vmem:[%s954_s11 + $0x8] sm:$0xff] %v377_v59  ;;  %495 = vst [vmem:[%s955_s12 + $0x8] sm:$0xff] %v491_v61 }

</bundles_post_ra>
